<compile_context>
chip_gen: v6e
topology: v6e:2x2x1
jax: 0.10.0
libtpu: 0.0.40
codegen_flags: <defaults>
</compile_context>

<pallas_src>
import functools
import math

import jax
import jax.numpy as jnp
from jax.experimental import pallas as pl
from jax.experimental.pallas import tpu as pltpu

NEG_INF = -1.0e7           # matches the module's self.neg_inf
MXU_DTYPE = jnp.bfloat16   # bf16 MXU inputs, f32 accumulation


# --------------------------------------------------------------------------
# In-kernel helpers
# --------------------------------------------------------------------------
def _mm(a, b):
    """a:(M,K) f32 @ b:(K,N) bf16 -> f32.  bf16 MXU inputs, f32 accumulation."""
    return jax.lax.dot_general(
        a.astype(MXU_DTYPE), b,
        dimension_numbers=(((1,), (0,)), ((), ())),
        preferred_element_type=jnp.float32)


def _softmax_rows(scores):
    """Numerically-stable softmax over the last axis (keys), exact f32."""
    scores = scores - jnp.max(scores, axis=-1, keepdims=True)
    e = jnp.exp(scores)
    return e / jnp.sum(e, axis=-1, keepdims=True)


# --------------------------------------------------------------------------
# Fused decoder-stack kernel (one grid step = one decoder layer, batch fused)
# --------------------------------------------------------------------------
def _decoder_stack_kernel(embed_ref, ann_ref,
                          wqkv_ref, bqkv_ref,
                          weq_ref, beq_ref,
                          wekv_ref, bekv_ref,
                          wm_ref, bm_ref,
                          wout_ref, bout_ref,
                          logits_ref, self_attn_ref, enc_attn_ref,
                          ctx_ref,
                          *, scale):
    l = pl.program_id(0)
    num_layers = pl.num_programs(0)
    B, T, Hp = ctx_ref.shape
    S = ann_ref.shape[1]

    @pl.when(l == 0)
    def _():
        ctx_ref[...] = embed_ref[...]

    x = ctx_ref[...]                                   # (B, T, Hp) f32
    x2 = x.reshape(B * T, Hp)
    ann2 = ann_ref[...].reshape(B * S, ann_ref.shape[-1])   # (B*S, H)

    # ---- causal self-attention (fused QKV, 128-lane-aligned splits) --------
    qkv = _mm(x2, wqkv_ref[0]) + bqkv_ref[0]           # (B*T, 3Hp)
    qkv = qkv.reshape(B, T, 3 * Hp)
    q, k, v = qkv[..., :Hp], qkv[..., Hp:2 * Hp], qkv[..., 2 * Hp:]
    scores = jnp.einsum('bqd,bkd->bqk', q.astype(MXU_DTYPE), k.astype(MXU_DTYPE),
                        preferred_element_type=jnp.float32) * scale   # (B, T, T)
    qi = jax.lax.broadcasted_iota(jnp.int32, (T, T), 0)
    ki = jax.lax.broadcasted_iota(jnp.int32, (T, T), 1)
    scores = scores + jnp.where(ki > qi, NEG_INF, 0.0)[None]          # additive mask
    self_attn = _softmax_rows(scores)                                 # (B, T, T)
    ctx_self = jnp.einsum('bqk,bkd->bqd', self_attn.astype(MXU_DTYPE),
                          v.astype(MXU_DTYPE), preferred_element_type=jnp.float32)
    r1 = x + ctx_self

    # ---- encoder attention (fused KV, 128-lane-aligned split) --------------
    r1_2 = r1.reshape(B * T, Hp)
    q_e = (_mm(r1_2, weq_ref[0]) + beq_ref[0]).reshape(B, T, Hp)
    kv_e = (_mm(ann2, wekv_ref[0]) + bekv_ref[0]).reshape(B, S, 2 * Hp)
    k_e, v_e = kv_e[..., :Hp], kv_e[..., Hp:]
    scores_e = jnp.einsum('bqd,bkd->bqk', q_e.astype(MXU_DTYPE), k_e.astype(MXU_DTYPE),
                          preferred_element_type=jnp.float32) * scale  # (B, T, S)
    enc_attn = _softmax_rows(scores_e)
    ctx_enc = jnp.einsum('bqk,bkd->bqd', enc_attn.astype(MXU_DTYPE),
                         v_e.astype(MXU_DTYPE), preferred_element_type=jnp.float32)
    r2 = r1 + ctx_enc

    # ---- MLP (Linear + ReLU) + residual -------------------------------------
    r2_2 = r2.reshape(B * T, Hp)
    mlp = jnp.maximum(_mm(r2_2, wm_ref[0]) + bm_ref[0], 0.0)
    new_ctx2 = r2_2 + mlp
    ctx_ref[...] = new_ctx2.reshape(B, T, Hp)

    # Attention weights kept query-major in-kernel; permuted outside (plumbing).
    self_attn_ref[0] = self_attn
    enc_attn_ref[0] = enc_attn

    # ---- final vocab projection fused into the last layer step --------------
    @pl.when(l == num_layers - 1)
    def _():
        Vp = logits_ref.shape[-1]
        logits = _mm(new_ctx2, wout_ref[...]) + bout_ref[...]   # (B*T, Vp) lane-dense
        logits_ref[...] = logits.reshape(B, T, Vp)


def decoder_stack_pallas(embed, annotations, p, hidden_size):
    """Full decoder stack (+ vocab projection) in one pallas_call, grid = layers."""
    B, T, Hp = embed.shape
    S, H = annotations.shape[1], annotations.shape[2]
    L = p["w_qkv"].shape[0]
    Vp = p["w_out"].shape[1]
    scale = 1.0 / math.sqrt(hidden_size)
    kernel = functools.partial(_decoder_stack_kernel, scale=scale)
    return pl.pallas_call(
        kernel,
        out_shape=(jax.ShapeDtypeStruct((B, T, Vp), jnp.float32),
                   jax.ShapeDtypeStruct((L, B, T, T), jnp.float32),
                   jax.ShapeDtypeStruct((L, B, T, S), jnp.float32)),
        grid=(L,),
        in_specs=[
            pl.BlockSpec((B, T, Hp), lambda l: (0, 0, 0)),        # embed (init ctx)
            pl.BlockSpec((B, S, H), lambda l: (0, 0, 0)),         # annotations
            pl.BlockSpec((1, Hp, 3 * Hp), lambda l: (l, 0, 0)),   # w_qkv (bf16)
            pl.BlockSpec((1, 1, 3 * Hp), lambda l: (l, 0, 0)),    # b_qkv
            pl.BlockSpec((1, Hp, Hp), lambda l: (l, 0, 0)),       # w_enc_q (bf16)
            pl.BlockSpec((1, 1, Hp), lambda l: (l, 0, 0)),        # b_enc_q
            pl.BlockSpec((1, H, 2 * Hp), lambda l: (l, 0, 0)),    # w_enc_kv (bf16)
            pl.BlockSpec((1, 1, 2 * Hp), lambda l: (l, 0, 0)),    # b_enc_kv
            pl.BlockSpec((1, Hp, Hp), lambda l: (l, 0, 0)),       # w_mlp (bf16)
            pl.BlockSpec((1, 1, Hp), lambda l: (l, 0, 0)),        # b_mlp
            pl.BlockSpec((Hp, Vp), lambda l: (0, 0)),             # w_out (bf16)
            pl.BlockSpec((1, Vp), lambda l: (0, 0)),              # b_out
        ],
        out_specs=(pl.BlockSpec((B, T, Vp), lambda l: (0, 0, 0)),
                   pl.BlockSpec((1, B, T, T), lambda l: (l, 0, 0, 0)),
                   pl.BlockSpec((1, B, T, S), lambda l: (l, 0, 0, 0))),
        scratch_shapes=[pltpu.VMEM((B, T, Hp), jnp.float32)],     # resident contexts
        compiler_params=pltpu.CompilerParams(
            dimension_semantics=("arbitrary",)),
    )(embed, annotations,
      p["w_qkv"], p["b_qkv"], p["w_eq"], p["b_eq"],
      p["w_ekv"], p["b_ekv"], p["w_mlp"], p["b_mlp"],
      p["w_out"], p["b_out"])


# --------------------------------------------------------------------------
# Parameter setup (PyTorch-style) + one-time layout prep + forward pass
# --------------------------------------------------------------------------
def create_positional_encodings(hidden_size, max_seq_len=1000):
    pos = jnp.arange(max_seq_len, dtype=jnp.float32)[:, None]
    dim = jnp.arange(hidden_size // 2, dtype=jnp.float32)[None, :]
    exponents = (2.0 * dim) / hidden_size
    trig_args = pos / (10000.0 ** exponents)
    pe = jnp.zeros((max_seq_len, hidden_size), dtype=jnp.float32)
    pe = pe.at[:, 0::2].set(jnp.sin(trig_args))
    pe = pe.at[:, 1::2].set(jnp.cos(trig_args))
    return pe


def init_linear(key, out_f, in_f):
    kw, kb = jax.random.split(key)
    bound = 1.0 / math.sqrt(in_f)
    w = jax.random.uniform(kw, (out_f, in_f), jnp.float32, -bound, bound)
    b = jax.random.uniform(kb, (1, out_f), jnp.float32, -bound, bound)
    return w, b


def init_params(key, vocab_size, hidden_size, num_layers):
    keys = jax.random.split(key, 2 + num_layers)
    params = {
        "embedding": jax.random.normal(keys[0], (vocab_size, hidden_size), jnp.float32),
        "pos_enc": create_positional_encodings(hidden_size),
        "layers": [],
    }
    params["out_w"], params["out_b"] = init_linear(keys[1], vocab_size, hidden_size)
    for i in range(num_layers):
        lk = jax.random.split(keys[2 + i], 7)
        layer = {
            "self": sum([init_linear(lk[j], hidden_size, hidden_size) for j in range(3)], ()),
            "enc": sum([init_linear(lk[3 + j], hidden_size, hidden_size) for j in range(3)], ()),
        }
        layer["mlp_w"], layer["mlp_b"] = init_linear(lk[6], hidden_size, hidden_size)
        params["layers"].append(layer)
    return params


def _pad_to(w, rows, cols):
    out = jnp.zeros((rows, cols), w.dtype)
    return out.at[:w.shape[0], :w.shape[1]].set(w)


def prepare_params(params, hidden_size, vocab_size):
    """One-time layout prep (hoisted out of forward):
    (out,in)->(in,out) transpose, QKV/KV fusion, zero-pad hidden->128 and
    vocab->128 for lane-dense MXU feeds/splits/stores, bf16 weight cast,
    per-layer stacking to (L, ...) for layer-grid indexing."""
    H = hidden_size
    Hp = pl.cdiv(H, 128) * 128
    Vp = pl.cdiv(vocab_size, 128) * 128

    w_qkv, b_qkv, w_eq, b_eq, w_ekv, b_ekv, w_m, b_m = ([] for _ in range(8))
    for layer in params["layers"]:
        wq, bq, wk, bk, wv, bv = layer["self"]
        weq, beq, wek, bek, wev, bev = layer["enc"]
        w_qkv.append(jnp.concatenate(
            [_pad_to(wq.T, Hp, Hp), _pad_to(wk.T, Hp, Hp), _pad_to(wv.T, Hp, Hp)], axis=1))
        b_qkv.append(jnp.concatenate(
            [_pad_to(bq, 1, Hp), _pad_to(bk, 1, Hp), _pad_to(bv, 1, Hp)], axis=1))
        w_eq.append(_pad_to(weq.T, Hp, Hp))
        b_eq.append(_pad_to(beq, 1, Hp))
        w_ekv.append(jnp.concatenate(
            [_pad_to(wek.T, H, Hp), _pad_to(wev.T, H, Hp)], axis=1))
        b_ekv.append(jnp.concatenate(
            [_pad_to(bek, 1, Hp), _pad_to(bev, 1, Hp)], axis=1))
        w_m.append(_pad_to(layer["mlp_w"].T, Hp, Hp))
        b_m.append(_pad_to(layer["mlp_b"], 1, Hp))

    return {
        "embedding": _pad_to(params["embedding"], params["embedding"].shape[0], Hp),
        "pos_enc": _pad_to(params["pos_enc"], params["pos_enc"].shape[0], Hp),
        "w_qkv": jnp.stack(w_qkv).astype(MXU_DTYPE),   # (L, Hp, 3Hp)
        "b_qkv": jnp.stack(b_qkv),                     # (L, 1, 3Hp)
        "w_eq": jnp.stack(w_eq).astype(MXU_DTYPE),     # (L, Hp, Hp)
        "b_eq": jnp.stack(b_eq),                       # (L, 1, Hp)
        "w_ekv": jnp.stack(w_ekv).astype(MXU_DTYPE),   # (L, H, 2Hp)
        "b_ekv": jnp.stack(b_ekv),                     # (L, 1, 2Hp)
        "w_mlp": jnp.stack(w_m).astype(MXU_DTYPE),     # (L, Hp, Hp)
        "b_mlp": jnp.stack(b_m),                       # (L, 1, Hp)
        "w_out": _pad_to(params["out_w"].T, Hp, Vp).astype(MXU_DTYPE),  # (Hp, Vp)
        "b_out": _pad_to(params["out_b"], 1, Vp),      # (1, Vp)
    }


@functools.partial(jax.jit, static_argnames=("hidden_size", "vocab_size"))
def transformer_decoder_forward(prepared, inputs, annotations, *, hidden_size, vocab_size):
    T = inputs.shape[1]
    # TODO(synk): embedding gather + positional-encoding add kept as JAX glue
    # (tiny vocab gather; no clean BlockSpec equivalent).
    embed = prepared["embedding"][inputs] + prepared["pos_enc"][:T]   # (B, T, Hp)

    logits_p, self_attn, enc_attn = decoder_stack_pallas(
        embed, annotations, prepared, hidden_size)

    output = logits_p[:, :, :vocab_size]                              # strip vocab pad
    # Permute query-major kernel outputs to the PyTorch key-major convention.
    encoder_attention_weights = jnp.transpose(enc_attn, (0, 1, 3, 2))  # (L, B, S, T)
    self_attention_weights = jnp.transpose(self_attn, (0, 1, 3, 2))    # (L, B, T, T)
    return output, (encoder_attention_weights, self_attention_weights)


# --------------------------------------------------------------------------
if __name__ == "__main__":
    vocab_size = 20
    hidden_size = 32
    num_layers = 2
    batch_size = 2
    dec_seq_len = 8
    enc_seq_len = 16

    key = jax.random.PRNGKey(0)
    k_params, k_inp, k_ann = jax.random.split(key, 3)

    params = init_params(k_params, vocab_size, hidden_size, num_layers)
    prepared = prepare_params(params, hidden_size, vocab_size)   # one-time prep

    inputs = jax.random.randint(k_inp, (batch_size, dec_seq_len), 0, vocab_size)
    annotations = jax.random.normal(
        k_ann, (batch_size, enc_seq_len, hidden_size), jnp.float32)

    output, (enc_w, self_w) = transformer_decoder_forward(
        prepared, inputs, annotations,
        hidden_size=hidden_size, vocab_size=vocab_size)

    jax.block_until_ready((output, enc_w, self_w))
    assert output.shape == (batch_size, dec_seq_len, vocab_size)
    assert enc_w.shape == (num_layers, batch_size, enc_seq_len, dec_seq_len)
    assert self_w.shape == (num_layers, batch_size, dec_seq_len, dec_seq_len)
    assert bool(jnp.all(jnp.isfinite(output)))
    print("KERNEL_OK")
</pallas_src>

<mosaic_0001>
module attributes {stable_mosaic.version = 11 : i64} {
  func.func @_decoder_stack_kernel(%arg0: i32, %arg1: memref<2x8x128xf32, #tpu.memory_space<vmem>>, %arg2: memref<2x16x32xf32, #tpu.memory_space<vmem>>, %arg3: memref<1x128x384xbf16, #tpu.memory_space<vmem>>, %arg4: memref<1x1x384xf32, #tpu.memory_space<vmem>>, %arg5: memref<1x128x128xbf16, #tpu.memory_space<vmem>>, %arg6: memref<1x1x128xf32, #tpu.memory_space<vmem>>, %arg7: memref<1x32x256xbf16, #tpu.memory_space<vmem>>, %arg8: memref<1x1x256xf32, #tpu.memory_space<vmem>>, %arg9: memref<1x128x128xbf16, #tpu.memory_space<vmem>>, %arg10: memref<1x1x128xf32, #tpu.memory_space<vmem>>, %arg11: memref<128x128xbf16, #tpu.memory_space<vmem>>, %arg12: memref<1x128xf32, #tpu.memory_space<vmem>>, %arg13: memref<2x8x128xf32, #tpu.memory_space<vmem>>, %arg14: memref<1x2x8x8xf32, #tpu.memory_space<vmem>>, %arg15: memref<1x2x8x16xf32, #tpu.memory_space<vmem>>, %arg16: memref<2x8x128xf32, #tpu.memory_space<vmem>>) attributes {dimension_semantics = [#tpu.dimension_semantics<arbitrary>], iteration_bounds = array<i64: 2>, scalar_prefetch = 0 : i64, scratch_operands = 1 : i64, tpu.core_type = #tpu.core_type<tc>, window_params = [{pipeline_mode = #tpu.pipeline_mode<synchronous>, transform_indices = @transform_0, window_bounds = array<i64: 2, 8, 128>}, {pipeline_mode = #tpu.pipeline_mode<synchronous>, transform_indices = @transform_1, window_bounds = array<i64: 2, 16, 32>}, {transform_indices = @transform_2, window_bounds = array<i64: 1, 128, 384>}, {transform_indices = @transform_3, window_bounds = array<i64: 1, 1, 384>}, {transform_indices = @transform_4, window_bounds = array<i64: 1, 128, 128>}, {transform_indices = @transform_5, window_bounds = array<i64: 1, 1, 128>}, {transform_indices = @transform_6, window_bounds = array<i64: 1, 32, 256>}, {transform_indices = @transform_7, window_bounds = array<i64: 1, 1, 256>}, {transform_indices = @transform_8, window_bounds = array<i64: 1, 128, 128>}, {transform_indices = @transform_9, window_bounds = array<i64: 1, 1, 128>}, {pipeline_mode = #tpu.pipeline_mode<synchronous>, transform_indices = @transform_10, window_bounds = array<i64: 128, 128>}, {pipeline_mode = #tpu.pipeline_mode<synchronous>, transform_indices = @transform_11, window_bounds = array<i64: 1, 128>}, {pipeline_mode = #tpu.pipeline_mode<synchronous>, transform_indices = @transform_12, window_bounds = array<i64: 2, 8, 128>}, {transform_indices = @transform_13, window_bounds = array<i64: 1, 2, 8, 8>}, {transform_indices = @transform_14, window_bounds = array<i64: 1, 2, 8, 16>}]} {
    %c0_i32 = arith.constant 0 : i32
    %0 = arith.cmpi eq, %arg0, %c0_i32 : i32
    %1 = arith.extui %0 : i1 to i32
    %c0_i32_0 = arith.constant 0 : i32
    %2 = arith.cmpi ne, %1, %c0_i32_0 : i32
    scf.if %2 {
      %c0_58 = arith.constant 0 : index
      %c0_59 = arith.constant 0 : index
      %c0_60 = arith.constant 0 : index
      %108 = vector.load %arg1[%c0_58, %c0_59, %c0_60] : memref<2x8x128xf32, #tpu.memory_space<vmem>>, vector<2x8x128xf32>
      %c0_61 = arith.constant 0 : index
      %c0_62 = arith.constant 0 : index
      %c0_63 = arith.constant 0 : index
      %109 = vector.load %arg16[%c0_61, %c0_62, %c0_63] : memref<2x8x128xf32, #tpu.memory_space<vmem>>, vector<2x8x128xf32>
      tpu.vector_store %arg16[%c0_61, %c0_62, %c0_63], %108 {strides = array<i32>} : memref<2x8x128xf32, #tpu.memory_space<vmem>>, vector<2x8x128xf32>,
    } else {
    }
    %c0 = arith.constant 0 : index
    %c0_1 = arith.constant 0 : index
    %c0_2 = arith.constant 0 : index
    %3 = vector.load %arg16[%c0, %c0_1, %c0_2] : memref<2x8x128xf32, #tpu.memory_space<vmem>>, vector<2x8x128xf32>
    %4 = vector.shape_cast %3 : vector<2x8x128xf32> to vector<16x128xf32>
    %c0_3 = arith.constant 0 : index
    %c0_4 = arith.constant 0 : index
    %c0_5 = arith.constant 0 : index
    %5 = vector.load %arg2[%c0_3, %c0_4, %c0_5] : memref<2x16x32xf32, #tpu.memory_space<vmem>>, vector<2x16x32xf32>
    %6 = vector.shape_cast %5 : vector<2x16x32xf32> to vector<32x32xf32>
    %c0_6 = arith.constant 0 : index
    %c0_7 = arith.constant 0 : index
    %c0_8 = arith.constant 0 : index
    %7 = vector.load %arg3[%c0_6, %c0_7, %c0_8] : memref<1x128x384xbf16, #tpu.memory_space<vmem>>, vector<1x128x384xbf16>
    %8 = vector.shape_cast %7 : vector<1x128x384xbf16> to vector<128x384xbf16>
    %9 = arith.truncf %4 : vector<16x128xf32> to vector<16x128xbf16>
    %cst = arith.constant dense<0.000000e+00> : vector<16x384xf32>
    %10 = tpu.matmul %9, %8, %cst {dimension_numbers = #tpu.dot_dimension_numbers<[1], [0], [0], [1], [0, 0, 1, 1], [], []>} : vector<16x128xbf16>, vector<128x384xbf16>, vector<16x384xf32> -> vector<16x384xf32>
    %c0_9 = arith.constant 0 : index
    %c0_10 = arith.constant 0 : index
    %c0_11 = arith.constant 0 : index
    %11 = vector.load %arg4[%c0_9, %c0_10, %c0_11] : memref<1x1x384xf32, #tpu.memory_space<vmem>>, vector<1x1x384xf32>
    %12 = vector.shape_cast %11 : vector<1x1x384xf32> to vector<1x384xf32>
    %13 = vector.broadcast %12 : vector<1x384xf32> to vector<16x384xf32>
    %14 = arith.addf %10, %13 : vector<16x384xf32>
    %15 = vector.shape_cast %14 : vector<16x384xf32> to vector<2x8x384xf32>
    %16 = vector.extract_strided_slice %15 {offsets = [0, 0, 0], sizes = [2, 8, 128], strides = [1, 1, 1]} : vector<2x8x384xf32> to vector<2x8x128xf32>
    %17 = vector.extract_strided_slice %15 {offsets = [0, 0, 128], sizes = [2, 8, 128], strides = [1, 1, 1]} : vector<2x8x384xf32> to vector<2x8x128xf32>
    %18 = vector.extract_strided_slice %15 {offsets = [0, 0, 256], sizes = [2, 8, 128], strides = [1, 1, 1]} : vector<2x8x384xf32> to vector<2x8x128xf32>
    %19 = arith.truncf %16 : vector<2x8x128xf32> to vector<2x8x128xbf16>
    %20 = arith.truncf %17 : vector<2x8x128xf32> to vector<2x8x128xbf16>
    "tpu.trace_start"() <{level = 10 : i32, message = "bqd,bkd->bqk"}> : () -> ()
    %cst_12 = arith.constant dense<0.000000e+00> : vector<2x8x8xf32>
    %21 = tpu.matmul %19, %20, %cst_12 {dimension_numbers = #tpu.dot_dimension_numbers<[2], [2], [1], [1], [0, 0, 0, 1, 1, 1], [0], [0]>} : vector<2x8x128xbf16>, vector<2x8x128xbf16>, vector<2x8x8xf32> -> vector<2x8x8xf32>
    "tpu.trace_stop"() : () -> ()
    %cst_13 = arith.constant 0.176776692 : f32
    %22 = vector.broadcast %cst_13 : f32 to vector<2x8x8xf32>
    %23 = arith.mulf %21, %22 : vector<2x8x8xf32>
    %24 = tpu.iota {dimensions = array<i32: 0>} : vector<8x8xi32>
    %25 = tpu.iota {dimensions = array<i32: 1>} : vector<8x8xi32>
    %26 = arith.cmpi sgt, %25, %24 : vector<8x8xi32>
    %cst_14 = arith.constant -1.000000e+07 : f32
    %cst_15 = arith.constant 0.000000e+00 : f32
    %27 = vector.broadcast %cst_14 : f32 to vector<8x8xf32>
    %28 = vector.broadcast %cst_15 : f32 to vector<8x8xf32>
    %29 = arith.select %26, %27, %28 : vector<8x8xi1>, vector<8x8xf32>
    %30 = vector.shape_cast %29 : vector<8x8xf32> to vector<1x8x8xf32>
    %31 = vector.broadcast %30 : vector<1x8x8xf32> to vector<2x8x8xf32>
    %32 = arith.addf %23, %31 : vector<2x8x8xf32>
    %cst_16 = arith.constant dense<0xFF800000> : vector<2x8xf32>
    %33 = vector.multi_reduction <maximumf>, %32, %cst_16 [2] : vector<2x8x8xf32> to vector<2x8xf32>
    %34 = vector.shape_cast %33 : vector<2x8xf32> to vector<2x8x1xf32>
    %35 = vector.broadcast %34 : vector<2x8x1xf32> to vector<2x8x8xf32>
    %36 = arith.subf %32, %35 : vector<2x8x8xf32>
    %37 = math.exp %36 : vector<2x8x8xf32>
    %cst_17 = arith.constant dense<0.000000e+00> : vector<2x8xf32>
    %38 = vector.multi_reduction <add>, %37, %cst_17 [2] : vector<2x8x8xf32> to vector<2x8xf32>
    %39 = vector.shape_cast %38 : vector<2x8xf32> to vector<2x8x1xf32>
    %40 = vector.broadcast %39 : vector<2x8x1xf32> to vector<2x8x8xf32>
    %41 = arith.divf %37, %40 : vector<2x8x8xf32>
    %42 = arith.truncf %41 : vector<2x8x8xf32> to vector<2x8x8xbf16>
    %43 = arith.truncf %18 : vector<2x8x128xf32> to vector<2x8x128xbf16>
    "tpu.trace_start"() <{level = 10 : i32, message = "bqk,bkd->bqd"}> : () -> ()
    %cst_18 = arith.constant dense<0.000000e+00> : vector<2x8x128xf32>
    %44 = tpu.matmul %42, %43, %cst_18 {dimension_numbers = #tpu.dot_dimension_numbers<[2], [1], [1], [2], [0, 0, 0, 1, 1, 2], [0], [0]>} : vector<2x8x8xbf16>, vector<2x8x128xbf16>, vector<2x8x128xf32> -> vector<2x8x128xf32>
    "tpu.trace_stop"() : () -> ()
    %45 = arith.addf %3, %44 : vector<2x8x128xf32>
    %46 = vector.shape_cast %45 : vector<2x8x128xf32> to vector<16x128xf32>
    %c0_19 = arith.constant 0 : index
    %c0_20 = arith.constant 0 : index
    %c0_21 = arith.constant 0 : index
    %47 = vector.load %arg5[%c0_19, %c0_20, %c0_21] : memref<1x128x128xbf16, #tpu.memory_space<vmem>>, vector<1x128x128xbf16>
    %48 = vector.shape_cast %47 : vector<1x128x128xbf16> to vector<128x128xbf16>
    %49 = arith.truncf %46 : vector<16x128xf32> to vector<16x128xbf16>
    %cst_22 = arith.constant dense<0.000000e+00> : vector<16x128xf32>
    %50 = tpu.matmul %49, %48, %cst_22 {dimension_numbers = #tpu.dot_dimension_numbers<[1], [0], [0], [1], [0, 0, 1, 1], [], []>} : vector<16x128xbf16>, vector<128x128xbf16>, vector<16x128xf32> -> vector<16x128xf32>
    %c0_23 = arith.constant 0 : index
    %c0_24 = arith.constant 0 : index
    %c0_25 = arith.constant 0 : index
    %51 = vector.load %arg6[%c0_23, %c0_24, %c0_25] : memref<1x1x128xf32, #tpu.memory_space<vmem>>, vector<1x1x128xf32>
    %52 = vector.shape_cast %51 : vector<1x1x128xf32> to vector<1x128xf32>
    %53 = vector.broadcast %52 : vector<1x128xf32> to vector<16x128xf32>
    %54 = arith.addf %50, %53 : vector<16x128xf32>
    %55 = vector.shape_cast %54 : vector<16x128xf32> to vector<2x8x128xf32>
    %c0_26 = arith.constant 0 : index
    %c0_27 = arith.constant 0 : index
    %c0_28 = arith.constant 0 : index
    %56 = vector.load %arg7[%c0_26, %c0_27, %c0_28] : memref<1x32x256xbf16, #tpu.memory_space<vmem>>, vector<1x32x256xbf16>
    %57 = vector.shape_cast %56 : vector<1x32x256xbf16> to vector<32x256xbf16>
    %58 = arith.truncf %6 : vector<32x32xf32> to vector<32x32xbf16>
    %cst_29 = arith.constant dense<0.000000e+00> : vector<32x256xf32>
    %59 = tpu.matmul %58, %57, %cst_29 {dimension_numbers = #tpu.dot_dimension_numbers<[1], [0], [0], [1], [0, 0, 1, 1], [], []>} : vector<32x32xbf16>, vector<32x256xbf16>, vector<32x256xf32> -> vector<32x256xf32>
    %c0_30 = arith.constant 0 : index
    %c0_31 = arith.constant 0 : index
    %c0_32 = arith.constant 0 : index
    %60 = vector.load %arg8[%c0_30, %c0_31, %c0_32] : memref<1x1x256xf32, #tpu.memory_space<vmem>>, vector<1x1x256xf32>
    %61 = vector.shape_cast %60 : vector<1x1x256xf32> to vector<1x256xf32>
    %62 = vector.broadcast %61 : vector<1x256xf32> to vector<32x256xf32>
    %63 = arith.addf %59, %62 : vector<32x256xf32>
    %64 = vector.shape_cast %63 : vector<32x256xf32> to vector<2x16x256xf32>
    %65 = vector.extract_strided_slice %64 {offsets = [0, 0, 0], sizes = [2, 16, 128], strides = [1, 1, 1]} : vector<2x16x256xf32> to vector<2x16x128xf32>
    %66 = vector.extract_strided_slice %64 {offsets = [0, 0, 128], sizes = [2, 16, 128], strides = [1, 1, 1]} : vector<2x16x256xf32> to vector<2x16x128xf32>
    %67 = arith.truncf %55 : vector<2x8x128xf32> to vector<2x8x128xbf16>
    %68 = arith.truncf %65 : vector<2x16x128xf32> to vector<2x16x128xbf16>
    "tpu.trace_start"() <{level = 10 : i32, message = "bqd,bkd->bqk"}> : () -> ()
    %cst_33 = arith.constant dense<0.000000e+00> : vector<2x8x16xf32>
    %69 = tpu.matmul %67, %68, %cst_33 {dimension_numbers = #tpu.dot_dimension_numbers<[2], [2], [1], [1], [0, 0, 0, 1, 1, 1], [0], [0]>} : vector<2x8x128xbf16>, vector<2x16x128xbf16>, vector<2x8x16xf32> -> vector<2x8x16xf32>
    "tpu.trace_stop"() : () -> ()
    %cst_34 = arith.constant 0.176776692 : f32
    %70 = vector.broadcast %cst_34 : f32 to vector<2x8x16xf32>
    %71 = arith.mulf %69, %70 : vector<2x8x16xf32>
    %cst_35 = arith.constant dense<0xFF800000> : vector<2x8xf32>
    %72 = vector.multi_reduction <maximumf>, %71, %cst_35 [2] : vector<2x8x16xf32> to vector<2x8xf32>
    %73 = vector.shape_cast %72 : vector<2x8xf32> to vector<2x8x1xf32>
    %74 = vector.broadcast %73 : vector<2x8x1xf32> to vector<2x8x16xf32>
    %75 = arith.subf %71, %74 : vector<2x8x16xf32>
    %76 = math.exp %75 : vector<2x8x16xf32>
    %cst_36 = arith.constant dense<0.000000e+00> : vector<2x8xf32>
    %77 = vector.multi_reduction <add>, %76, %cst_36 [2] : vector<2x8x16xf32> to vector<2x8xf32>
    %78 = vector.shape_cast %77 : vector<2x8xf32> to vector<2x8x1xf32>
    %79 = vector.broadcast %78 : vector<2x8x1xf32> to vector<2x8x16xf32>
    %80 = arith.divf %76, %79 : vector<2x8x16xf32>
    %81 = arith.truncf %80 : vector<2x8x16xf32> to vector<2x8x16xbf16>
    %82 = arith.truncf %66 : vector<2x16x128xf32> to vector<2x16x128xbf16>
    "tpu.trace_start"() <{level = 10 : i32, message = "bqk,bkd->bqd"}> : () -> ()
    %cst_37 = arith.constant dense<0.000000e+00> : vector<2x8x128xf32>
    %83 = tpu.matmul %81, %82, %cst_37 {dimension_numbers = #tpu.dot_dimension_numbers<[2], [1], [1], [2], [0, 0, 0, 1, 1, 2], [0], [0]>} : vector<2x8x16xbf16>, vector<2x16x128xbf16>, vector<2x8x128xf32> -> vector<2x8x128xf32>
    "tpu.trace_stop"() : () -> ()
    %84 = arith.addf %45, %83 : vector<2x8x128xf32>
    %85 = vector.shape_cast %84 : vector<2x8x128xf32> to vector<16x128xf32>
    %c0_38 = arith.constant 0 : index
    %c0_39 = arith.constant 0 : index
    %c0_40 = arith.constant 0 : index
    %86 = vector.load %arg9[%c0_38, %c0_39, %c0_40] : memref<1x128x128xbf16, #tpu.memory_space<vmem>>, vector<1x128x128xbf16>
    %87 = vector.shape_cast %86 : vector<1x128x128xbf16> to vector<128x128xbf16>
    %88 = arith.truncf %85 : vector<16x128xf32> to vector<16x128xbf16>
    %cst_41 = arith.constant dense<0.000000e+00> : vector<16x128xf32>
    %89 = tpu.matmul %88, %87, %cst_41 {dimension_numbers = #tpu.dot_dimension_numbers<[1], [0], [0], [1], [0, 0, 1, 1], [], []>} : vector<16x128xbf16>, vector<128x128xbf16>, vector<16x128xf32> -> vector<16x128xf32>
    %c0_42 = arith.constant 0 : index
    %c0_43 = arith.constant 0 : index
    %c0_44 = arith.constant 0 : index
    %90 = vector.load %arg10[%c0_42, %c0_43, %c0_44] : memref<1x1x128xf32, #tpu.memory_space<vmem>>, vector<1x1x128xf32>
    %91 = vector.shape_cast %90 : vector<1x1x128xf32> to vector<1x128xf32>
    %92 = vector.broadcast %91 : vector<1x128xf32> to vector<16x128xf32>
    %93 = arith.addf %89, %92 : vector<16x128xf32>
    %cst_45 = arith.constant 0.000000e+00 : f32
    %94 = vector.broadcast %cst_45 : f32 to vector<16x128xf32>
    %95 = arith.maximumf %93, %94 : vector<16x128xf32>
    %96 = arith.addf %85, %95 : vector<16x128xf32>
    %97 = vector.shape_cast %96 : vector<16x128xf32> to vector<2x8x128xf32>
    %c0_46 = arith.constant 0 : index
    %c0_47 = arith.constant 0 : index
    %c0_48 = arith.constant 0 : index
    %98 = vector.load %arg16[%c0_46, %c0_47, %c0_48] : memref<2x8x128xf32, #tpu.memory_space<vmem>>, vector<2x8x128xf32>
    tpu.vector_store %arg16[%c0_46, %c0_47, %c0_48], %97 {strides = array<i32>} : memref<2x8x128xf32, #tpu.memory_space<vmem>>, vector<2x8x128xf32>,
    %c0_49 = arith.constant 0 : index
    %c0_50 = arith.constant 0 : index
    %c0_51 = arith.constant 0 : index
    %c0_52 = arith.constant 0 : index
    %99 = vector.load %arg14[%c0_49, %c0_50, %c0_51, %c0_52] : memref<1x2x8x8xf32, #tpu.memory_space<vmem>>, vector<1x2x8x8xf32>
    %100 = vector.shape_cast %99 : vector<1x2x8x8xf32> to vector<2x8x8xf32>
    %101 = vector.shape_cast %41 : vector<2x8x8xf32> to vector<1x2x8x8xf32>
    tpu.vector_store %arg14[%c0_49, %c0_50, %c0_51, %c0_52], %101 {strides = array<i32>} : memref<1x2x8x8xf32, #tpu.memory_space<vmem>>, vector<1x2x8x8xf32>,
    %c0_53 = arith.constant 0 : index
    %c0_54 = arith.constant 0 : index
    %c0_55 = arith.constant 0 : index
    %c0_56 = arith.constant 0 : index
    %102 = vector.load %arg15[%c0_53, %c0_54, %c0_55, %c0_56] : memref<1x2x8x16xf32, #tpu.memory_space<vmem>>, vector<1x2x8x16xf32>
    %103 = vector.shape_cast %102 : vector<1x2x8x16xf32> to vector<2x8x16xf32>
    %104 = vector.shape_cast %80 : vector<2x8x16xf32> to vector<1x2x8x16xf32>
    tpu.vector_store %arg15[%c0_53, %c0_54, %c0_55, %c0_56], %104 {strides = array<i32>} : memref<1x2x8x16xf32, #tpu.memory_space<vmem>>, vector<1x2x8x16xf32>,
    %c1_i32 = arith.constant 1 : i32
    %105 = arith.cmpi eq, %arg0, %c1_i32 : i32
    %106 = arith.extui %105 : i1 to i32
    %c0_i32_57 = arith.constant 0 : i32
    %107 = arith.cmpi ne, %106, %c0_i32_57 : i32
    scf.if %107 {
      %c0_58 = arith.constant 0 : index
      %c0_59 = arith.constant 0 : index
      %108 = vector.load %arg11[%c0_58, %c0_59] : memref<128x128xbf16, #tpu.memory_space<vmem>>, vector<128x128xbf16>
      %109 = arith.truncf %96 : vector<16x128xf32> to vector<16x128xbf16>
      %cst_60 = arith.constant dense<0.000000e+00> : vector<16x128xf32>
      %110 = tpu.matmul %109, %108, %cst_60 {dimension_numbers = #tpu.dot_dimension_numbers<[1], [0], [0], [1], [0, 0, 1, 1], [], []>} : vector<16x128xbf16>, vector<128x128xbf16>, vector<16x128xf32> -> vector<16x128xf32>
      %c0_61 = arith.constant 0 : index
      %c0_62 = arith.constant 0 : index
      %111 = vector.load %arg12[%c0_61, %c0_62] : memref<1x128xf32, #tpu.memory_space<vmem>>, vector<1x128xf32>
      %112 = vector.broadcast %111 : vector<1x128xf32> to vector<16x128xf32>
      %113 = arith.addf %110, %112 : vector<16x128xf32>
      %114 = vector.shape_cast %113 : vector<16x128xf32> to vector<2x8x128xf32>
      %c0_63 = arith.constant 0 : index
      %c0_64 = arith.constant 0 : index
      %c0_65 = arith.constant 0 : index
      %115 = vector.load %arg13[%c0_63, %c0_64, %c0_65] : memref<2x8x128xf32, #tpu.memory_space<vmem>>, vector<2x8x128xf32>
      tpu.vector_store %arg13[%c0_63, %c0_64, %c0_65], %114 {strides = array<i32>} : memref<2x8x128xf32, #tpu.memory_space<vmem>>, vector<2x8x128xf32>,
    } else {
    }
    return
  }
  func.func @transform_0(%arg0: i32) -> (i32, i32, i32) {
    %c0_i32 = arith.constant 0 : i32
    %c0_i32_0 = arith.constant 0 : i32
    %c0_i32_1 = arith.constant 0 : i32
    %c0_i32_2 = arith.constant 0 : i32
    return %c0_i32, %c0_i32_0, %c0_i32_1 : i32, i32, i32
  }
  func.func @transform_1(%arg0: i32) -> (i32, i32, i32) {
    %c0_i32 = arith.constant 0 : i32
    %c0_i32_0 = arith.constant 0 : i32
    %c0_i32_1 = arith.constant 0 : i32
    %c0_i32_2 = arith.constant 0 : i32
    return %c0_i32, %c0_i32_0, %c0_i32_1 : i32, i32, i32
  }
  func.func @transform_2(%arg0: i32) -> (i32, i32, i32) {
    %c0_i32 = arith.constant 0 : i32
    %c0_i32_0 = arith.constant 0 : i32
    %c0_i32_1 = arith.constant 0 : i32
    return %arg0, %c0_i32, %c0_i32_0 : i32, i32, i32
  }
  func.func @transform_3(%arg0: i32) -> (i32, i32, i32) {
    %c0_i32 = arith.constant 0 : i32
    %c0_i32_0 = arith.constant 0 : i32
    %c0_i32_1 = arith.constant 0 : i32
    return %arg0, %c0_i32, %c0_i32_0 : i32, i32, i32
  }
  func.func @transform_4(%arg0: i32) -> (i32, i32, i32) {
    %c0_i32 = arith.constant 0 : i32
    %c0_i32_0 = arith.constant 0 : i32
    %c0_i32_1 = arith.constant 0 : i32
    return %arg0, %c0_i32, %c0_i32_0 : i32, i32, i32
  }
  func.func @transform_5(%arg0: i32) -> (i32, i32, i32) {
    %c0_i32 = arith.constant 0 : i32
    %c0_i32_0 = arith.constant 0 : i32
    %c0_i32_1 = arith.constant 0 : i32
    return %arg0, %c0_i32, %c0_i32_0 : i32, i32, i32
  }
  func.func @transform_6(%arg0: i32) -> (i32, i32, i32) {
    %c0_i32 = arith.constant 0 : i32
    %c0_i32_0 = arith.constant 0 : i32
    %c0_i32_1 = arith.constant 0 : i32
    return %arg0, %c0_i32, %c0_i32_0 : i32, i32, i32
  }
  func.func @transform_7(%arg0: i32) -> (i32, i32, i32) {
    %c0_i32 = arith.constant 0 : i32
    %c0_i32_0 = arith.constant 0 : i32
    %c0_i32_1 = arith.constant 0 : i32
    return %arg0, %c0_i32, %c0_i32_0 : i32, i32, i32
  }
  func.func @transform_8(%arg0: i32) -> (i32, i32, i32) {
    %c0_i32 = arith.constant 0 : i32
    %c0_i32_0 = arith.constant 0 : i32
    %c0_i32_1 = arith.constant 0 : i32
    return %arg0, %c0_i32, %c0_i32_0 : i32, i32, i32
  }
  func.func @transform_9(%arg0: i32) -> (i32, i32, i32) {
    %c0_i32 = arith.constant 0 : i32
    %c0_i32_0 = arith.constant 0 : i32
    %c0_i32_1 = arith.constant 0 : i32
    return %arg0, %c0_i32, %c0_i32_0 : i32, i32, i32
  }
  func.func @transform_10(%arg0: i32) -> (i32, i32) {
    %c0_i32 = arith.constant 0 : i32
    %c0_i32_0 = arith.constant 0 : i32
    %c0_i32_1 = arith.constant 0 : i32
    return %c0_i32, %c0_i32_0 : i32, i32
  }
  func.func @transform_11(%arg0: i32) -> (i32, i32) {
    %c0_i32 = arith.constant 0 : i32
    %c0_i32_0 = arith.constant 0 : i32
    %c0_i32_1 = arith.constant 0 : i32
    return %c0_i32, %c0_i32_0 : i32, i32
  }
  func.func @transform_12(%arg0: i32) -> (i32, i32, i32) {
    %c0_i32 = arith.constant 0 : i32
    %c0_i32_0 = arith.constant 0 : i32
    %c0_i32_1 = arith.constant 0 : i32
    %c0_i32_2 = arith.constant 0 : i32
    return %c0_i32, %c0_i32_0, %c0_i32_1 : i32, i32, i32
  }
  func.func @transform_13(%arg0: i32) -> (i32, i32, i32, i32) {
    %c0_i32 = arith.constant 0 : i32
    %c0_i32_0 = arith.constant 0 : i32
    %c0_i32_1 = arith.constant 0 : i32
    %c0_i32_2 = arith.constant 0 : i32
    return %arg0, %c0_i32, %c0_i32_0, %c0_i32_1 : i32, i32, i32, i32
  }
  func.func @transform_14(%arg0: i32) -> (i32, i32, i32, i32) {
    %c0_i32 = arith.constant 0 : i32
    %c0_i32_0 = arith.constant 0 : i32
    %c0_i32_1 = arith.constant 0 : i32
    %c0_i32_2 = arith.constant 0 : i32
    return %arg0, %c0_i32, %c0_i32_0, %c0_i32_1 : i32, i32, i32, i32
  }
}

</mosaic_0001>

<bundles_post_ra>
// kernel: transformer_decoder_forward.1
= control target key start
LH: loop header
LB: loop body
LE: loop exit
PB: predicated region body
PF: predicated region fallthrough
CT: control target
= control target key end

     0   :  { %s3675_s0 = inlined_call_operand.vmem [shape: f32[2,8,128], index: 0, kind: input, shape index: {}]   ;;  %s3676_s1 = inlined_call_operand.vmem [shape: f32[2,16,32], index: 1, kind: input, shape index: {}]   ;;  %s3677_s2 = inlined_call_operand.hbm [shape: bf16[2,128,384], index: 2, kind: input, shape index: {}]   ;;  %s3678_s3 = inlined_call_operand.hbm [shape: f32[2,1,384], index: 3, kind: input, shape index: {}]   ;;  %s3679_s4 = inlined_call_operand.vmem [shape: bf16[2,128,128], index: 4, kind: input, shape index: {}]   ;;  %s3680_s5 = inlined_call_operand.hbm [shape: f32[2,1,128], index: 5, kind: input, shape index: {}]   ;;  %s3681_s6 = inlined_call_operand.vmem [shape: bf16[2,32,256], index: 6, kind: input, shape index: {}]   ;;  %s3682_s7 = inlined_call_operand.hbm [shape: f32[2,1,256], index: 7, kind: input, shape index: {}]   ;;  %s3683_s8 = inlined_call_operand.hbm [shape: bf16[2,128,128], index: 8, kind: input, shape index: {}]   ;;  %s3684_s9 = inlined_call_operand.hbm [shape: f32[2,1,128], index: 9, kind: input, shape index: {}]   ;;  %s3685_s10 = inlined_call_operand.hbm [shape: bf16[128,128], index: 10, kind: input, shape index: {}]   ;;  %s3686_s11 = inlined_call_operand.hbm [shape: f32[1,128], index: 11, kind: input, shape index: {}]   ;;  %s3687_s12 = inlined_call_operand.hbm [shape: f32[2,8,128], index: 12, kind: output, shape index: {0}]   ;;  %s3688_s13 = inlined_call_operand.vmem [shape: f32[2,2,8,8], index: 13, kind: output, shape index: {1}]   ;;  %s3689_s14 = inlined_call_operand.hbm [shape: f32[2,2,8,16], index: 14, kind: output, shape index: {2}]  }
   0x1   :  { %3710 = sst [smem:[#allocation34_spill]] %s3675_s0 }
   0x2   :  { %3711 = sst [smem:[#allocation35_spill]] %s3676_s1 }
   0x3   :  { %3712 = sst [smem:[#allocation36_spill]] %s3677_s2 }
   0x4   :  { %3713 = sst [smem:[#allocation37_spill]] %s3678_s3 }
   0x5   :  { %3714 = sst [smem:[#allocation38_spill]] %s3679_s4 }
   0x6   :  { %3715 = sst [smem:[#allocation39_spill]] %s3680_s5 }
   0x7   :  { %3716 = sst [smem:[#allocation40_spill]] %s3681_s6 }
   0x8   :  { %3717 = sst [smem:[#allocation41_spill]] %s3685_s10 }
   0x9   :  { %3718 = sst [smem:[#allocation42_spill]] %s3687_s12 }
   0xa   :  { %3719 = sst [smem:[#allocation43_spill]] %s3688_s13 }
   0xb   :  { %3720 = sst [smem:[#allocation44_spill]] %s3689_s14 }
   0xc   :  { %20 = vsyncpa [#allocation4], 0 }
   0xd   :  { %22 = vsyncpa [#allocation4 + $0x1], 0 }
   0xe   :  { %23 = vsyncpa [#allocation7], 0 }
   0xf   :  { %25 = vsyncpa [#allocation7 + $0x1], 0 }
  0x10   :  { %26 = vsyncpa [#allocation10], 0 }
  0x11   :  { %28 = vsyncpa [#allocation10 + $0x1], 0 }
  0x12   :  { %29 = vsyncpa [#allocation13], 0 }
  0x13   :  { %31 = vsyncpa [#allocation13 + $0x1], 0 }
  0x14   :  { %32 = vsyncpa [#allocation16], 0 }
  0x15   :  { %33 = vsyncpa [#allocation5], 0 }
  0x16   :  { %34 = vsyncpa [#allocation19], 0 }
  0x17   :  { %36 = vsyncpa [#allocation19 + $0x1], 0  ;;  %s3088_s29 = smov 0   ;;  %s3090_s30 = smov 0  }
  0x18   :  { %s3092_s15 = smov 0   ;;  %s3094_s16 = smov 0  }
  0x19 LB: > { %3721 = sst [smem:[#allocation28_spill]] %s2978_s29  ;;  %s3109_s17 = sadd.s32 4294967295, %s2990_s16   ;;  %s2990_s16 = sphi %s3094_s16, %s3772_s16   ;;  %s2986_s15 = sphi %s3092_s15, %s3774_s15   ;;  %s2982_s30 = sphi %s3090_s30, %s3776_s30   ;;  %s2978_s29 = sphi %s3088_s29, %s3775_s29  }
  0x1a   : > { %3722 = sst [smem:[#allocation29_spill]] %s2986_s15  ;;  %s2181_s18 = sadd.s32 4294967294, %s2990_s16  }
  0x1b   : > { %s3113_s19 = sadd.s32 1, %s2990_s16   ;;  %s91_s20 = sadd.s32 1, %s2986_s15 }
  0x1c   : > { %3723 = sst [smem:[#allocation30_spill]] %s3113_s19  ;;  %s88_s21 = ssub.s32 %s2990_s16, %s3113_s19 }
  0x1d   : > { %p98_p0 = scmp.ne.s32.totalorder %s2986_s15, %s2982_s30  ;;  %p89_p1 = scmp.eq.s32.totalorder %s88_s21, 0 }
  0x1e   : > { %p99_p2 = scmp.eq.s32.totalorder %s2990_s16, 0  ;;  %p104_p3 = scmp.ne.s32.totalorder %s2982_s30, %s2978_s29 }
  0x1f   : > { %p3693_p4 = scmp.eq.s32.totalorder %s3109_s17, 0  ;;  %p3692_p7 = scmp.eq.s32.totalorder %s3109_s17, 1 }
  0x20   : > { %s3125_s22 = scalar_select %p89_p1, %s2986_s15, %s91_s20  }
  0x21   : > { %p3127_p5 = por %p99_p2, %p98_p0  ;;  %p3133_p6 = por %p3693_p4, %p104_p3 }
  0x22   : > { %3724 = sst [smem:[#allocation31_spill]] %s3125_s22  ;;  %p405_p8 = scmp.eq.s32.totalorder %s2181_s18, 1 }
  0x23   : > { %s3726_s24 = scalar_select %p3133_p6, 1, 0 }
  0x24   : > { %p2182_p9 = scmp.ge.s32.totalorder %s2990_s16, 1  ;;  %p412_p10 = scmp.lt.s32.totalorder %s2990_s16, 3 }
  0x25   : > { %p3142_p11 = por %p3692_p7, %p98_p0  ;;  %p3146_p12 = por %p405_p8, %p104_p3 }
  0x26   : > { %p3150_p13 = pnand %p2182_p9, %p412_p10  ;;  %s2992_s28 = smov [#allocation14]  }
  0x27   : > { %s3727_s25 = scalar_select %p3142_p11, 1, 0 }
  0x28   : > { %s3729_s26 = scalar_select %p3146_p12, 1, 0 }
  0x29   : > { %3728 = sst [smem:[#allocation32_spill]] %s3727_s25  ;;  %p2496_p2 = pneg %p3150_p13 }
  0x2a   : > { %3730 = sst [smem:[#allocation33_spill]] %s3729_s26  ;;  %s430_s18 = sshll.u32 %s2992_s28, 4  ;;  %s431_s18 = int_to_ptr.vmem [resolvable:$true] %s430_s18 }
  0x2b   : > { %s3731_s27 = scalar_select %p3150_p13, 1, 0 }
  0x2c   : > { %p3159_p0 = pnand %p2496_p2, %p3693_p4  ;;  %p2528_p8 = scmp.lt.s32.totalorder %s2990_s16, 2 }
  0x2d   : > { %s3166_s21 = sand.u32 1, %s2986_s15   ;;  %s3169_s22 = sand.u32 1, %s2990_s16  }
  0x2e   : > { %s3732_s20 = scalar_select %p3159_p0, 1, 0 }
  0x2f   : > { %p3705_p9 = pneg %p3159_p0  ;;  %s2669_s19 = scalar_lea.vmem %s431_s18, 1024 }
  0x30   : > { %p2670_p10 = scmp.ne.s32.totalorder %s431_s18, %s2669_s19  ;;  %p2677_p2 = scmp.lt.s32.totalorder %s431_s18, %s431_s18 }
  0x31   : > { %p2678_p4 = scmp.lt.s32.totalorder %s2669_s19, %s2669_s19 }
  0x32   : > { %p2672_p7 = pnand %p2670_p10, %p3705_p9 }
  0x33   : > { %p2679_p12 = por %p2678_p4, %p2677_p2 }
  0x34   : > { %p2673_p1 = pneg %p2672_p7 }
  0x36   : > { %p2680_p11 = pnand %p2679_p12, %p2673_p1 }
  0x38   : > { %2683 = shalt.err (!%p2680_p11)
}
  0x39   : > { %s3703_s28 = smov 64   ;;  %s3704_s15 = smov 4  }
  0x3a   : > { %s3733_s10 = sld [smem:[#allocation41_spill]]  ;;  %p3188_p4 = pnand %p2528_p8, %p3127_p5 }
  0x3b   : > { %s2466_s14 = smul.u32 3, %s3166_s21  ;;  %s3735_s3 = sld [smem:[#allocation37_spill]] }
  0x3c   : > { %s2467_s12 = smul.u32 48, %s2990_s16  ;;  %p3205_p7 = pneg %p3188_p4 }
  0x3d   : > { %s480_s29 = scalar_lea.vmem [#allocation6], %s2466_s14 }
  0x3e   : > { %s488_s26 = sshll.u32 %s480_s29, 4  ;;  %s489_s26 = int_to_ptr.vmem [resolvable:$true] %s488_s26 }
  0x40   : > { %2499 = dma.hbm_to_vmem [thread:$0]  (!%p3159_p0), %s3733_s10, 1024, %s431_s18, [#allocation13], %s3703_s28, %s3703_s28, %s3704_s15  }
  0x41   : > { %s3198_s13 = scalar_lea.hbm %s3735_s3, %s2467_s12  ;;  %s2689_s12 = scalar_lea.hbm %s3735_s3, 96 }
  0x42   : > { %s2684_s18 = scalar_lea.hbm %s3198_s13, 48  ;;  %p2690_p1 = scmp.lt.s32.totalorder %s3198_s13, %s3735_s3 }
  0x43   : > { %p2685_p5 = scmp.ne.s32.totalorder %s3198_s13, %s2684_s18  ;;  %p2691_p8 = scmp.lt.s32.totalorder %s2689_s12, %s2684_s18 }
  0x45   : > { %p2687_p11 = pnand %p3205_p7, %p2685_p5  ;;  %p2692_p10 = por %p2691_p8, %p2690_p1 }
  0x47   : > { %p2688_p12 = pneg %p2687_p11 }
  0x49   : > { %p2693_p2 = pnand %p2692_p10, %p2688_p12 }
  0x4b   : > { %2696 = shalt.err (!%p2693_p2)
}
  0x4c   : > { %s2697_s29 = scalar_lea.vmem %s489_s26, 48  ;;  %s2995_s25 = smov [#allocation6]  }
  0x4d   : > { %p2698_p3 = scmp.ne.s32.totalorder %s489_s26, %s2697_s29  ;;  %s2702_s23 = sshll.u32 %s2995_s25, 4  ;;  %s2703_s23 = int_to_ptr.vmem [resolvable:$false] %s2702_s23 }
  0x4e   : > { %s2704_s10 = scalar_lea.vmem %s2703_s23, 96  ;;  %p2705_p5 = scmp.lt.s32.totalorder %s489_s26, %s2703_s23 }
  0x4f   : > { %p2700_p9 = pnand %p2698_p3, %p3205_p7  ;;  %p2706_p11 = scmp.lt.s32.totalorder %s2704_s10, %s2697_s29 }
  0x51   : > { %p2701_p6 = pneg %p2700_p9  ;;  %p2707_p13 = por %p2706_p11, %p2705_p5 }
  0x53   : > { %p2708_p0 = pnand %p2707_p13, %p2701_p6 }
  0x55   : > { %2711 = shalt.err (!%p2708_p0)
}
  0x56   : > { %s3737_s15 = scalar_lea.sflag [#allocation7], %s3169_s22  ;;  %s2278_s18 = sshll.u32 %s2990_s16, 5 }
  0x57   : > { %2509 = dma.hbm_to_vmem [thread:$0]  (!%p3188_p4), %s3198_s13, 48, %s489_s26, %s3737_s15  }
  0x58   : > { %s3738_s0 = sshll.u32 %s3166_s21, 1  ;;  %s538_s10 = scalar_lea.hbm %s3682_s7, %s2278_s18 }
  0x59   : > { %s532_s25 = scalar_lea.vmem [#allocation9], %s3738_s0  ;;  %s529_s14 = scalar_lea.sflag [#allocation10], %s3169_s22 }
  0x5a   : > { %s540_s1 = sshll.u32 %s532_s25, 4  ;;  %s2712_s29 = scalar_lea.hbm %s538_s10, 32  ;;  %s541_s1 = int_to_ptr.vmem [resolvable:$true] %s540_s1 }
  0x5b   : > { %p2713_p6 = scmp.ne.s32.totalorder %s538_s10, %s2712_s29  ;;  %s2717_s4 = scalar_lea.hbm %s3682_s7, 64 }
  0x5c   : > { %p2718_p3 = scmp.lt.s32.totalorder %s538_s10, %s3682_s7  ;;  %p2719_p9 = scmp.lt.s32.totalorder %s2717_s4, %s2712_s29 }
  0x5d   : > { %p2715_p13 = pnand %p2713_p6, %p3205_p7 }
  0x5e   : > { %p2720_p12 = por %p2719_p9, %p2718_p3 }
  0x5f   : > { %p2716_p0 = pneg %p2715_p13 }
  0x61   : > { %p2721_p1 = pnand %p2720_p12, %p2716_p0 }
  0x63   : > { %2724 = shalt.err (!%p2721_p1)
}
  0x64   : > { %s2725_s15 = scalar_lea.vmem %s541_s1, 32  ;;  %s2996_s18 = smov [#allocation9]  }
  0x65   : > { %p2726_p8 = scmp.ne.s32.totalorder %s541_s1, %s2725_s15  ;;  %s2730_s0 = sshll.u32 %s2996_s18, 4  ;;  %s2731_s0 = int_to_ptr.vmem [resolvable:$false] %s2730_s0 }
  0x66   : > { %s2732_s25 = scalar_lea.vmem %s2731_s0, 64  ;;  %p2733_p5 = scmp.lt.s32.totalorder %s541_s1, %s2731_s0 }
  0x67   : > { %p2728_p10 = pnand %p2726_p8, %p3205_p7  ;;  %p2734_p11 = scmp.lt.s32.totalorder %s2732_s25, %s2725_s15 }
  0x69   : > { %p2729_p2 = pneg %p2728_p10  ;;  %p2735_p6 = por %p2734_p11, %p2733_p5 }
  0x6b   : > { %p2736_p13 = pnand %p2735_p6, %p2729_p2 }
  0x6d   : > { %2739 = shalt.err (!%p2736_p13)
}
  0x6e   : > { %2515 = dma.hbm_to_vmem [thread:$0]  (!%p3188_p4), %s538_s10, 32, %s541_s1, %s529_s14  }
  0x6f   : > { %s2997_s3 = smov [#allocation15]   ;;  %s2464_s6 = smul.u32 192, %s3166_s21 }
  0x70   : > { %s444_s4 = sshll.u32 %s2997_s3, 4  ;;  %s2465_s12 = smul.u32 3072, %s2990_s16  ;;  %s445_s4 = int_to_ptr.vmem [resolvable:$true] %s444_s4 }
  0x71   : > { %s2751_s23 = scalar_lea.vmem %s445_s4, 16  ;;  %p3739_p3 = scmp.ne.s32.totalorder %s3732_s20, 0 }
  0x72   : > { %p2752_p0 = scmp.ne.s32.totalorder %s445_s4, %s2751_s23  ;;  %s2758_s29 = scalar_lea.vmem %s445_s4, 32 }
  0x73   : > { %p3740_p9 = pneg %p3739_p3  ;;  %p2759_p8 = scmp.lt.s32.totalorder %s445_s4, %s445_s4 }
  0x74   : > { %p2760_p10 = scmp.lt.s32.totalorder %s2758_s29, %s2751_s23 }
  0x75   : > { %p2754_p12 = pnand %p2752_p0, %p3740_p9 }
  0x76   : > { %p2761_p2 = por %p2760_p10, %p2759_p8 }
  0x77   : > { %p2755_p1 = pneg %p2754_p12 }
  0x79   : > { %p2762_p5 = pnand %p2761_p2, %p2755_p1 }
  0x7b   : > { %2765 = shalt.err (!%p2762_p5)
}
  0x7c   : > { %2502 = dma.hbm_to_vmem [thread:$0]  (!%p3739_p3), %s3686_s11, 16, %s445_s4, [#allocation16]  }
  0x7d   : > { %s3741_s2 = sld [smem:[#allocation36_spill]]  ;;  %s459_s18 = scalar_lea.vmem [#allocation3], %s2464_s6 }
  0x7e   : > { %s466_s0 = sshll.u32 %s459_s18, 4  ;;  %s456_s25 = scalar_lea.sflag [#allocation4], %s3166_s21  ;;  %s3261_s0 = int_to_ptr.vmem [resolvable:$true] %s466_s0 }
  0x83   : > { %s3259_s15 = scalar_lea.hbm %s3741_s2, %s2465_s12  ;;  %s2771_s23 = scalar_lea.hbm %s3741_s2, 6144 }
  0x84   : > { %s2766_s20 = scalar_lea.hbm %s3259_s15, 3072  ;;  %p2772_p0 = scmp.lt.s32.totalorder %s3259_s15, %s3741_s2 }
  0x85   : > { %p2767_p11 = scmp.ne.s32.totalorder %s3259_s15, %s2766_s20  ;;  %p2773_p3 = scmp.lt.s32.totalorder %s2771_s23, %s2766_s20 }
  0x87   : > { %p2769_p6 = pnand %p2767_p11, %p3205_p7  ;;  %p2774_p9 = por %p2773_p3, %p2772_p0 }
  0x89   : > { %p2770_p13 = pneg %p2769_p6 }
  0x8b   : > { %p2775_p12 = pnand %p2774_p9, %p2770_p13 }
  0x8d   : > { %2778 = shalt.err (!%p2775_p12)
}
  0x8e   : > { %s2779_s6 = scalar_lea.vmem %s3261_s0, 3072  ;;  %s2998_s1 = smov [#allocation3]  }
  0x8f   : > { %p2780_p1 = scmp.ne.s32.totalorder %s3261_s0, %s2779_s6  ;;  %s2784_s10 = sshll.u32 %s2998_s1, 4  ;;  %s2785_s10 = int_to_ptr.vmem [resolvable:$false] %s2784_s10 }
  0x90   : > { %s2786_s13 = scalar_lea.vmem %s2785_s10, 6144  ;;  %p2787_p2 = scmp.lt.s32.totalorder %s3261_s0, %s2785_s10 }
  0x91   : > { %p2782_p8 = pnand %p2780_p1, %p3205_p7  ;;  %p2788_p5 = scmp.lt.s32.totalorder %s2786_s13, %s2779_s6 }
  0x93   : > { %p2783_p10 = pneg %p2782_p8  ;;  %p2789_p11 = por %p2788_p5, %p2787_p2 }
  0x95   : > { %p2790_p6 = pnand %p2789_p11, %p2783_p10 }
  0x97   : > { %2793 = shalt.err (!%p2790_p6)
}
  0x98   : > { %s2999_s26 = smov 192   ;;  %s3000_s18 = smov 12  }
  0x99   : > { %2506 = dma.hbm_to_vmem [thread:$0]  (!%p3188_p4), %s3259_s15, 3072, %s3261_s0, %s456_s25, %s2999_s26, %s2999_s26, %s3000_s18  }
  0x9a   : > { %s2188_s20 = sshll.u32 %s2990_s16, 4  ;;  %s3742_s5 = sld [smem:[#allocation39_spill]] }
  0x9b   : > { %s506_s29 = scalar_lea.vmem [#allocation8], %s3166_s21  ;;  %s2192_s6 = sshll.u32 %s3166_s21, 6 }
  0x9c   : > { %s513_s12 = sshll.u32 %s506_s29, 4  ;;  %s514_s12 = int_to_ptr.vmem [resolvable:$true] %s513_s12 }
  0xa0   : > { %s3292_s23 = scalar_lea.hbm %s3742_s5, %s2188_s20  ;;  %s2799_s25 = scalar_lea.hbm %s3742_s5, 32 }
  0xa1   : > { %s2794_s1 = scalar_lea.hbm %s3292_s23, 16  ;;  %p2800_p9 = scmp.lt.s32.totalorder %s3292_s23, %s3742_s5 }
  0xa2   : > { %p2795_p13 = scmp.ne.s32.totalorder %s3292_s23, %s2794_s1  ;;  %p2801_p12 = scmp.lt.s32.totalorder %s2799_s25, %s2794_s1 }
  0xa4   : > { %p2797_p0 = pnand %p2795_p13, %p3205_p7  ;;  %p2802_p1 = por %p2801_p12, %p2800_p9 }
  0xa6   : > { %p2798_p3 = pneg %p2797_p0 }
  0xa8   : > { %p2803_p8 = pnand %p2802_p1, %p2798_p3 }
  0xaa   : > { %2806 = shalt.err (!%p2803_p8)
}
  0xab   : > { %s2807_s26 = scalar_lea.vmem %s514_s12, 16  ;;  %s3001_s18 = smov [#allocation8]  }
  0xac   : > { %p2808_p10 = scmp.ne.s32.totalorder %s514_s12, %s2807_s26  ;;  %s2812_s3 = sshll.u32 %s3001_s18, 4  ;;  %s2813_s3 = int_to_ptr.vmem [resolvable:$false] %s2812_s3 }
  0xad   : > { %s2814_s4 = scalar_lea.vmem %s2813_s3, 32  ;;  %p2815_p11 = scmp.lt.s32.totalorder %s514_s12, %s2813_s3 }
  0xae   : > { %p2810_p2 = pnand %p2808_p10, %p3205_p7  ;;  %p2816_p6 = scmp.lt.s32.totalorder %s2814_s4, %s2807_s26 }
  0xb0   : > { %p2811_p5 = pneg %p2810_p2  ;;  %p2817_p13 = por %p2816_p6, %p2815_p11 }
  0xb2   : > { %p2818_p0 = pnand %p2817_p13, %p2811_p5 }
  0xb4   : > { %2821 = shalt.err (!%p2818_p0)
}
  0xb5   : > { %s3743_s29 = scalar_lea.sflag [#allocation7], %s3169_s22  ;;  %s2279_s1 = sshll.u32 %s2990_s16, 10 }
  0xb6   : > { %2512 = dma.hbm_to_vmem [thread:$0]  (!%p3188_p4), %s3292_s23, 16, %s514_s12, %s3743_s29  }
  0xb7   : > { %s3318_s25 = scalar_lea.hbm %s3683_s8, %s2279_s1  ;;  %s551_s10 = scalar_lea.vmem [#allocation11], %s2192_s6 }
  0xb8   : > { %s558_s13 = sshll.u32 %s551_s10, 4  ;;  %s2822_s26 = scalar_lea.hbm %s3318_s25, 1024  ;;  %s559_s13 = int_to_ptr.vmem [resolvable:$true] %s558_s13 }
  0xb9   : > { %p2823_p3 = scmp.ne.s32.totalorder %s3318_s25, %s2822_s26  ;;  %s2827_s23 = scalar_lea.hbm %s3683_s8, 2048 }
  0xba   : > { %p2828_p1 = scmp.lt.s32.totalorder %s3318_s25, %s3683_s8  ;;  %p2829_p8 = scmp.lt.s32.totalorder %s2827_s23, %s2822_s26 }
  0xbb   : > { %p2825_p9 = pnand %p2823_p3, %p3205_p7 }
  0xbc   : > { %p2830_p10 = por %p2829_p8, %p2828_p1 }
  0xbd   : > { %p2826_p12 = pneg %p2825_p9 }
  0xbf   : > { %p2831_p2 = pnand %p2830_p10, %p2826_p12 }
  0xc1   : > { %2834 = shalt.err (!%p2831_p2)
}
  0xc2   : > { %s2835_s6 = scalar_lea.vmem %s559_s13, 1024  ;;  %s3002_s29 = smov [#allocation11]  }
  0xc3   : > { %p2836_p5 = scmp.ne.s32.totalorder %s559_s13, %s2835_s6  ;;  %s2840_s1 = sshll.u32 %s3002_s29, 4  ;;  %s2841_s1 = int_to_ptr.vmem [resolvable:$false] %s2840_s1 }
  0xc4   : > { %s2842_s15 = scalar_lea.vmem %s2841_s1, 2048  ;;  %p2843_p13 = scmp.lt.s32.totalorder %s559_s13, %s2841_s1 }
  0xc5   : > { %p2838_p11 = pnand %p2836_p5, %p3205_p7  ;;  %p2844_p0 = scmp.lt.s32.totalorder %s2842_s15, %s2835_s6 }
  0xc7   : > { %p2839_p6 = pneg %p2838_p11  ;;  %p2845_p3 = por %p2844_p0, %p2843_p13 }
  0xc9   : > { %p2846_p9 = pnand %p2845_p3, %p2839_p6 }
  0xcb   : > { %2849 = shalt.err (!%p2846_p9)
}
  0xcc   : > { %s3744_s0 = smov 4   ;;  %s3745_s10 = smov 64  }
  0xcd   : > { %2518 = dma.hbm_to_vmem [thread:$0]  (!%p3188_p4), %s3318_s25, 1024, %s559_s13, %s529_s14, %s3745_s10, %s3745_s10, %s3744_s0  }
  0xce   : > { %s3346_s3 = scalar_lea.hbm %s3684_s9, %s2188_s20  ;;  %s571_s23 = scalar_lea.vmem [#allocation12], %s3166_s21 }
  0xcf   : > { %s578_s12 = sshll.u32 %s571_s23, 4  ;;  %s569_s4 = scalar_lea.sflag [#allocation13], %s3169_s22  ;;  %s579_s12 = int_to_ptr.vmem [resolvable:$true] %s578_s12 }
  0xd0   : > { %s2850_s6 = scalar_lea.hbm %s3346_s3, 16  ;;  %s2855_s25 = scalar_lea.hbm %s3684_s9, 32 }
  0xd1   : > { %p2851_p12 = scmp.ne.s32.totalorder %s3346_s3, %s2850_s6  ;;  %p2856_p10 = scmp.lt.s32.totalorder %s3346_s3, %s3684_s9 }
  0xd2   : > { %p2857_p2 = scmp.lt.s32.totalorder %s2855_s25, %s2850_s6 }
  0xd3   : > { %p2853_p1 = pnand %p2851_p12, %p3205_p7 }
  0xd4   : > { %p2858_p5 = por %p2857_p2, %p2856_p10 }
  0xd5   : > { %p2854_p8 = pneg %p2853_p1 }
  0xd7   : > { %p2859_p11 = pnand %p2858_p5, %p2854_p8 }
  0xd9   : > { %2862 = shalt.err (!%p2859_p11)
}
  0xda   : > { %s2863_s21 = scalar_lea.vmem %s579_s12, 16  ;;  %s3003_s22 = smov [#allocation12]  }
  0xdb   : > { %p2864_p6 = scmp.ne.s32.totalorder %s579_s12, %s2863_s21  ;;  %s2868_s20 = sshll.u32 %s3003_s22, 4  ;;  %s2869_s20 = int_to_ptr.vmem [resolvable:$false] %s2868_s20 }
  0xdc   : > { %s2870_s15 = scalar_lea.vmem %s2869_s20, 32  ;;  %p2871_p3 = scmp.lt.s32.totalorder %s579_s12, %s2869_s20 }
  0xdd   : > { %p2866_p13 = pnand %p2864_p6, %p3205_p7  ;;  %p2872_p9 = scmp.lt.s32.totalorder %s2870_s15, %s2863_s21 }
  0xdf   : > { %p2867_p0 = pneg %p2866_p13  ;;  %p2873_p12 = por %p2872_p9, %p2871_p3 }
  0xe1   : > { %p2874_p1 = pnand %p2873_p12, %p2867_p0 }
  0xe3   : > { %2877 = shalt.err (!%p2874_p1)
}
  0xe4   : > { %2521 = dma.hbm_to_vmem [thread:$0]  (!%p3188_p4), %s3346_s3, 16, %s579_s12, %s569_s4  }
  0xe5   : > { %p3746_p8 = scmp.ne.s32.totalorder %s3731_s27, 0 }
  0xe6   : > { %s3369_s28 = sand.u32 (!%p3746_p8), 1, %s2982_s30   ;;  %p3747_p7 = scmp.ne.s32.totalorder (!%p3746_p8), %s3726_s24, 0 }
  0xe7   : > { %587 = sbr.rel (%p3746_p8) target bundleno = 2618 (0xa3a), region = 68  ;;  %s590_s10 = scalar_lea.sflag (!%p3746_p8), [#allocation4], %s3369_s28 }
  0xe8   : > { %s2468_s0 = smul.u32 (!%p3746_p8), 192, %s3369_s28 }
  0xea   : > { %s3373_s26 = scalar_lea.vmem (!%p3746_p8), [#allocation3], %s2468_s0 }
  0xec   : > { %2945 = dma.done.wait (%p3747_p7), %s590_s10, 3072  }
  0xed   : > { %2947 = vsyncadd (%p3747_p7), %s590_s10, 4294964224  ;;  %s598_s27 = sand.u32 1, %s3109_s17   ;;  %s2469_s19 = smul.u32 3, %s3369_s28 }
  0xee   : > { %s599_s18 = scalar_lea.sflag [#allocation7], %s598_s27 }
  0xef   : > { %s3381_s3 = scalar_lea.vmem [#allocation6], %s2469_s19 }
  0xf0   : > { %2949 = dma.done.wait (%p3747_p7), %s599_s18, 64  }
  0xf1   : > { %2951 = vsyncadd (%p3747_p7), %s599_s18, 4294967232  ;;  %s2197_s23 = sshll.u32 %s3369_s28, 1  ;;  %s616_s4 = scalar_lea.sflag [#allocation10], %s598_s27 }
  0xf2   : > { %s3389_s6 = scalar_lea.vmem [#allocation9], %s2197_s23 }
  0xf3   : > { %2953 = dma.done.wait (%p3747_p7), %s616_s4, 1056  }
  0xf4   : > { %2955 = vsyncadd (%p3747_p7), %s616_s4, 4294966240  ;;  %s2198_s29 = sshll.u32 %s3369_s28, 6  ;;  %s634_s25 = scalar_lea.sflag [#allocation13], %s598_s27 }
  0xf5   : > { %s3396_s14 = scalar_lea.vmem [#allocation11], %s2198_s29 }
  0xf6   : > { %2957 = dma.done.wait (%p3747_p7), %s634_s25, 16  }
  0xf7   : > { %2959 = vsyncadd (%p3747_p7), %s634_s25, 4294967280  ;;  %p3748_p4 = scmp.eq.s32.totalorder %s3109_s17, 0 }
  0xf9   : > { %2961 = dma.done.wait (%p3748_p4), [#allocation13], 1024   ;;  %p3749_p10 = pmov %p3748_p4 }
  0xfa   : > { %p3750_p2 = pmov %p3748_p4 }
  0xfb   : > { %2963 = vsyncadd (%p3749_p10), [#allocation13], 4294966272 }
  0xfc   : > { %2965 = dma.done.wait (%p3750_p2), [#allocation16], 16   ;;  %p3751_p5 = pmov %p3750_p2 }
  0xfd   : > { %s2201_s1 = sshll.u32 %s3369_s28, 4  ;;  %p727_p11 = scmp.lt.s32.totalorder %s3109_s17, 1 }
  0xfe   : > { %2967 = vsyncadd (%p3751_p5), [#allocation16], 4294967280  ;;  %s3752_s0 = sld [smem:[#allocation38_spill]]  ;;  %s3429_s2 = scalar_lea.vmem [#allocation18], %s2201_s1 }
  0xff   : > { %s728_s21 = scalar_select %p727_p11, %s3109_s17, 1 }
 0x100   : > { %s3753_s18 = sld [smem:[#allocation40_spill]]  ;;  %p3755_p6 = scmp.ne.s32.totalorder %s3109_s17, 0 }
 0x101   : > { %s2280_s24 = sshll.u32 %s728_s21, 6  ;;  %s2281_s22 = sshll.u32 %s728_s21, 5 }
 0x102   : > { %s2282_s4 = sshll.u32 %s728_s21, 4  ;;  %s3754_s13 = sld [smem:[#allocation43_spill]] }
 0x104   : > { %s3417_s10 = scalar_lea.vmem %s3752_s0, %s2280_s24  ;;  %746 = sbr.rel (%p3755_p6) target bundleno = 269 (0x10d), region = 104 }
 0x105   : > { %s3756_s24 = sld [smem:[#allocation34_spill]] (!%p3755_p6) }
 0x106   : > { %s3422_s23 = scalar_lea.vmem %s3753_s18, %s2281_s22 }
 0x108   : > { %s3427_s12 = scalar_lea.vmem %s3754_s13, %s2282_s4 }
 0x10b   : > { %v747_v0 = vld [vmem:[%s3756_s24] sm:$0xff]  ;;  %v748_v1 = vld [vmem:[%s3756_s24 + $0x8] sm:$0xff] }
 0x10c   : > { %749 = vst [vmem:[#allocation2] sm:$0xff] %v747_v0  ;;  %750 = vst [vmem:[#allocation2 + $0x8] sm:$0xff] %v748_v1 }
 0x10d PF: > { %v2580_v2 = vld [vmem:[%s3373_s26 + $0xac] ss:$12 sps:$4 sm:$0xff]   ;;  %v2582_v3 = vld [vmem:[%s3373_s26 + $0xa8] ss:$12 sps:$4 sm:$0xff]   ;;  %v3004_v4 = vmov 0   ;;  %v3005_v5 = vmov 0.0   ;;  %v792_v31 = vlaneseq }
 0x10e   : > { %967 = vmatprep.mubr.bf16.mxu0 %v3004_v4  ;;  %2336 = vmatprep.subr.bf16.mxu1 %v3005_v5  ;;  %v2583_v6 = vld [vmem:[%s3373_s26 + $0x94] ss:$12 sps:$4 sm:$0xff]   ;;  %v2585_v7 = vld [vmem:[%s3373_s26 + $0x90] ss:$12 sps:$4 sm:$0xff]   ;;  %v2588_v9 = vld [vmem:[%s3373_s26 + $0x78] ss:$12 sps:$4 sm:$0xff]  }
 0x10f   : > { %935 = vmatprep.subr.bf16.mxu0 %v2580_v2  ;;  %v2586_v8 = vld [vmem:[%s3373_s26 + $0x7c] ss:$12 sps:$4 sm:$0xff]   ;;  %v2589_v10 = vld [vmem:[%s3373_s26 + $0x64] ss:$12 sps:$4 sm:$0xff]   ;;  %v2591_v11 = vld [vmem:[%s3373_s26 + $0x60] ss:$12 sps:$4 sm:$0xff]  }
 0x110   : > { %936 = vmatpush1.bf16.msra.mxu0 %v2582_v3  ;;  %v2592_v12 = vld [vmem:[%s3373_s26 + $0x4c] ss:$12 sps:$4 sm:$0xff]   ;;  %v2604_v13 = vld [vmem:[%s3373_s26 + $0xb0] ss:$12 sps:$4 sm:$0xff]   ;;  %v2594_v15 = vld [vmem:[%s3373_s26 + $0x48] ss:$12 sps:$4 sm:$0xff]  }
 0x111   : > { %937 = vmatprep.subr.bf16.mxu0 %v2583_v6  ;;  %2337 = vmatpush3.bf16.msra.mxu1 %v2604_v13  ;;  %v2605_v14 = vld [vmem:[%s3373_s26 + $0x98] ss:$12 sps:$4 sm:$0xff]   ;;  %v2595_v16 = vld [vmem:[%s3373_s26 + $0x34] ss:$12 sps:$4 sm:$0xff]   ;;  %v2597_v18 = vld [vmem:[%s3373_s26 + $0x30] ss:$12 sps:$4 sm:$0xff]  }
 0x112   : > { %2338 = vmatprep.subr.bf16.mxu1 %v3005_v5  ;;  %v2606_v17 = vld [vmem:[%s3373_s26 + $0x80] ss:$12 sps:$4 sm:$0xff]   ;;  %v2598_v19 = vld [vmem:[%s3373_s26 + $0x1c] ss:$12 sps:$4 sm:$0xff]   ;;  %v2600_v21 = vld [vmem:[%s3373_s26 + $0x18] ss:$12 sps:$4 sm:$0xff]  }
 0x113   : > { %v2607_v20 = vld [vmem:[%s3373_s26 + $0x68] ss:$12 sps:$4 sm:$0xff]   ;;  %v2601_v22 = vld [vmem:[%s3373_s26 + $0x4] ss:$12 sps:$4 sm:$0xff]   ;;  %v2603_v24 = vld [vmem:[%s3373_s26] ss:$12 sps:$4 sm:$0xff]  }
 0x114   : > { %938 = vmatpush1.bf16.msra.mxu0 %v2585_v7  ;;  %v2608_v23 = vld [vmem:[%s3373_s26 + $0x50] ss:$12 sps:$4 sm:$0xff]   ;;  %v2609_v27 = vld [vmem:[%s3373_s26 + $0x38] ss:$12 sps:$4 sm:$0xff]   ;;  %v2610_v29 = vld [vmem:[%s3373_s26 + $0x20] ss:$12 sps:$4 sm:$0xff]  }
 0x115   : > { %939 = vmatprep.subr.bf16.mxu0 %v2586_v8  ;;  %2339 = vmatpush3.bf16.msra.mxu1 %v2605_v14  ;;  %v3465_v25 = vld [vmem:[#allocation2] sm:$0xff]  ;;  %v3467_v26 = vld [vmem:[#allocation2 + $0x8] sm:$0xff]  ;;  %vm3006_vm0 = vmmov 0   ;;  %v3486_v32 = vshrl.u32 %v792_v31, 7  ;;  %v790_v34 = vld [vmem:[%s3381_s3] sm:$0x7] }
 0x116   : > { %2340 = vmatprep.subr.bf16.mxu1 %v3005_v5  ;;  %v789_v28 = vpack.c.bf16 %v3467_v26, %v3465_v25  ;;  %v2611_v30 = vld [vmem:[%s3373_s26 + $0x8] ss:$12 sps:$4 sm:$0xff]   ;;  %2352 = vmatprep.mubr.msk.bf16.mxu1 %vm3006_vm0, %v3005_v5  ;;  %vm1143_vm1 = vcmask 1043456   ;;  %v1108_v62 = vand.u32 127, %v792_v31  ;;  %vm1113_vm3 = vcmask 64512   ;;  %s3757_s3 = sld [smem:[#allocation35_spill]] }
 0x117   : > { %v798_v33 = vsub.s32 1, %v3486_v32  ;;  %v794_v36 = vsub.s32 0, %v3486_v32  ;;  %v802_v50 = vsub.s32 2, %v3486_v32  ;;  %v2621_v31 = vld [vmem:[%s3417_s10 + $0x20] sm:$0xff]   ;;  %vm1386_vm4 = vcmask 261120   ;;  %p2261_p13 = scmp.ne.s32.totalorder %s3109_s17, 1 }
 0x118   : > { %940 = vmatpush1.bf16.msra.mxu0 %v2588_v9  ;;  %vm1109_vm2 = vcmp.gt.s32.totalorder %v1108_v62, %v3486_v32  ;;  %vm1532_vm5 = vcmask 130048  }
 0x119   : > { %941 = vmatprep.subr.bf16.mxu0 %v2589_v10  ;;  %2341 = vmatpush3.bf16.msra.mxu1 %v2606_v17  ;;  %v799_v35 = vrot.slane %v790_v34, %v798_v33  ;;  %v795_v40 = vrot.slane %v790_v34, %v794_v36  ;;  %v803_v51 = vrot.slane %v790_v34, %v802_v50  ;;  %v1110_v0 = vsel %vm1109_vm2, -10000000.0, %v3005_v5  ;;  %v2622_v34 = vld [vmem:[%s3417_s10 + $0x18] sm:$0xff]  }
 0x11a   : > { %2342 = vmatprep.subr.bf16.mxu1 %v3005_v5 }
 0x11c   : > { %942 = vmatpush1.bf16.msra.mxu0 %v2591_v11 }
 0x11d   : > { %943 = vmatprep.subr.bf16.mxu0 %v2592_v12  ;;  %2343 = vmatpush3.bf16.msra.mxu1 %v2607_v20 }
 0x11e   : > { %2344 = vmatprep.subr.bf16.mxu1 %v3005_v5 }
 0x120   : > { %944 = vmatpush1.bf16.msra.mxu0 %v2594_v15 }
 0x121   : > { %945 = vmatprep.subr.bf16.mxu0 %v2595_v16  ;;  %2345 = vmatpush3.bf16.msra.mxu1 %v2608_v23 }
 0x122   : > { %2346 = vmatprep.subr.bf16.mxu1 %v3005_v5 }
 0x124   : > { %946 = vmatpush1.bf16.msra.mxu0 %v2597_v18 }
 0x125   : > { %947 = vmatprep.subr.bf16.mxu0 %v2598_v19  ;;  %2347 = vmatpush3.bf16.msra.mxu1 %v2609_v27 }
 0x126   : > { %2348 = vmatprep.subr.bf16.mxu1 %v3005_v5 }
 0x128   : > { %948 = vmatpush1.bf16.msra.mxu0 %v2600_v21 }
 0x129   : > { %949 = vmatprep.subr.bf16.mxu0 %v2601_v22  ;;  %2349 = vmatpush3.bf16.msra.mxu1 %v2610_v29  ;;  %v2619_v29 = vld [vmem:[%s3417_s10 + $0x30] sm:$0xff]  }
 0x12a   : > { %2350 = vmatprep.subr.bf16.mxu1 %v3005_v5 }
 0x12c   : > { %950 = vmatpush1.bf16.msra.mxu0 %v2603_v24 }
 0x12d   : > { %2380 = vmatprep.subr.bf16.mxu0 %v3005_v5  ;;  %2351 = vmatpush3.bf16.msra.mxu1 %v2611_v30  ;;  %v2620_v30 = vld [vmem:[%s3417_s10 + $0x28] sm:$0xff]  }
 0x12e   : > { %2356 = vmatprep.subr.bf16.mxu1 %v3005_v5 }
 0x12f   : > { %968 = vmatmul.mubr.bf16.vlgmr.msra.gmra.mxu0 %v789_v28 }
 0x130   : > { %2396 = vmatprep.mubr.msk.bf16.mxu0 %vm3006_vm0, %v3005_v5  ;;  %2353 = vmatmul.mubr.bf16.vlgmr.msra.gmra.mxu1 %v789_v28  ;;  %v2615_v28 = vld [vmem:[%s3417_s10 + $0x38] sm:$0xff]  }
 0x131   : > { %2358 = vmatprep.mubr.msk.bf16.mxu1 %vm3006_vm0, %v3005_v5  ;;  %2381 = vmatpush3.bf16.msra.mxu0 %v2615_v28 }
 0x132   : > { %2382 = vmatprep.subr.bf16.mxu0 %v3005_v5 }
 0x135   : > { %2383 = vmatpush3.bf16.msra.mxu0 %v2619_v29 }
 0x136   : > { %2384 = vmatprep.subr.bf16.mxu0 %v3005_v5 }
 0x139   : > { %2385 = vmatpush3.bf16.msra.mxu0 %v2620_v30 }
 0x13a   : > { %2386 = vmatprep.subr.bf16.mxu0 %v3005_v5 }
 0x13d   : > { %2387 = vmatpush3.bf16.msra.mxu0 %v2621_v31 }
 0x13e   : > { %2388 = vmatprep.subr.bf16.mxu0 %v3005_v5 }
 0x141   : > { %2389 = vmatpush3.bf16.msra.mxu0 %v2622_v34 }
 0x142   : > { %2390 = vmatprep.subr.bf16.mxu0 %v3005_v5 }
 0x1ef   : > { %v969_v37 = vpop.f32.mrf.mxu0 }
 0x1f0   : > { %v970_v44 = vadd.f32 %v969_v37, %v795_v40  ;;  %v1012_v52 = vpop.f32.mrf.mxu1 }
 0x1f1   : > { %v971_v38 = vpop.f32.mrf.mxu0  ;;  %v1013_v53 = vadd.f32 %v1012_v52, %v803_v51  ;;  %v755_v52 = vld [vmem:[%s3757_s3 + $0x10] sm:$0xff] }
 0x1f2   : > { %v972_v39 = vadd.f32 %v971_v38, %v799_v35  ;;  %v1019_v46 = vpack.c.bf16 %v970_v44, %v970_v44  ;;  %v2354_v54 = vpop.f32.mrf.mxu1  ;;  %v2612_v44 = vld [vmem:[%s3422_s23 + $0x10] ss:$8 sps:$4 sm:$0xff]  }
 0x1f3   : > { %v973_v41 = vpop.f32.mrf.mxu0  ;;  %v1138_v55 = vpack.c.bf16 %v1013_v53, %v1013_v53  ;;  %v756_v53 = vld [vmem:[%s3757_s3 + $0x18] sm:$0xff] }
 0x1f4   : > { %v1021_v42 = vpack.c.bf16 %v972_v39, %v972_v39  ;;  %v974_v48 = vadd.f32 %v973_v41, %v795_v40  ;;  %v1015_v56 = vpop.f32.mrf.mxu1  ;;  %v2614_v41 = vld [vmem:[%s3422_s23 + $0x14] ss:$8 sps:$4 sm:$0xff]   ;;  %v1353_v54 = vpack.c.bf16 %v756_v53, %v755_v52 }
 0x1f5   : > { %v975_v43 = vpop.f32.mrf.mxu0  ;;  %v1145_v57 = vsel %vm1143_vm1, %v1138_v55, 0  ;;  %v1016_v58 = vadd.f32 %v1015_v56, %v803_v51  ;;  %v2623_v51 = vld [vmem:[%s3417_s10 + $0x10] sm:$0xff]   ;;  %v2624_v55 = vld [vmem:[%s3417_s10 + $0x8] sm:$0xff]  }
 0x1f6   : > { %2357 = vmatpush3.bf16.xpose.msra.mxu1 %v1021_v42  ;;  %v976_v45 = vadd.f32 %v975_v43, %v799_v35  ;;  %v1020_v49 = vpack.c.bf16 %v974_v48, %v974_v48  ;;  %v2355_v59 = vpop.f32.mrf.mxu1  ;;  %v753_v48 = vld [vmem:[%s3757_s3] sm:$0xff]  ;;  %2391 = vmatpush3.bf16.msra.mxu0 %v2623_v51 }
 0x1f7   : > { %2362 = vmatprep.subr.bf16.mxu1 %v3005_v5  ;;  %v1139_v60 = vpack.c.bf16 %v1016_v58, %v1016_v58  ;;  %2392 = vmatprep.subr.bf16.mxu0 %v3005_v5 }
 0x1f8   : > { %v1022_v47 = vpack.c.bf16 %v976_v45, %v976_v45 }
 0x1f9   : > { %v1191_v61 = vsel %vm1143_vm1, %v1139_v60, 0 }
 0x1fa   : > { %2393 = vmatpush3.bf16.msra.mxu0 %v2624_v55 }
 0x1fb   : > { %2394 = vmatprep.subr.bf16.mxu0 %v3005_v5 }
 0x1fd   : > { %2359 = vmatmul.mubr.bf16.vlgmr.msra.gmra.mxu1 %v1019_v46  ;;  %v2618_v46 = vld [vmem:[%s3422_s23 + $0x4] ss:$8 sps:$4 sm:$0xff]  }
 0x1fe   : > { %2363 = vmatpush3.bf16.xpose.msra.mxu1 %v1022_v47  ;;  %2364 = vmatprep.mubr.msk.bf16.mxu1 %vm3006_vm0, %v3005_v5  ;;  %v2616_v47 = vld [vmem:[%s3422_s23] ss:$8 sps:$4 sm:$0xff]  }
 0x1ff   : > { %2368 = vmatprep.subr.bf16.mxu1 %v3005_v5 }
 0x205   : > { %2365 = vmatmul.mubr.bf16.vlgmr.msra.gmra.mxu1 %v1020_v49  ;;  %v754_v49 = vld [vmem:[%s3757_s3 + $0x8] sm:$0xff] }
 0x206   : > { %2370 = vmatprep.mubr.msk.bf16.mxu1 %vm3006_vm0, %v3005_v5  ;;  %2369 = vmatpush3.bf16.msra.mxu1 %v1145_v57  ;;  %v1352_v50 = vpack.c.bf16 %v754_v49, %v753_v48 }
 0x207   : > { %2374 = vmatprep.subr.bf16.mxu1 %v3005_v5 }
 0x2bd   : > { %v1057_v63 = vpop.f32.mrf.mxu1 }
 0x2be   : > { %v1103_v1 = vmul.f32 0.17677669, %v1057_v63 }
 0x2bf   : > { %v2360_v2 = vpop.f32.mrf.mxu1 }
 0x2c0   : > { %v1111_v3 = vadd.f32 %v1110_v0, %v1103_v1  ;;  %v1354_v1 = vld [vmem:[%s3389_s6] sm:$0x3]  ;;  %s3758_s6 = scalar_lea.vmem [#allocation8], %s3369_s28 }
 0x2c1   : > { %v1060_v6 = vpop.f32.mrf.mxu1  ;;  %v2235_v32 = vld [vmem:[%s3758_s6] ss:$0 sm:$0xff] }
 0x2c2   : > { %v1114_v7 = vsel %vm1113_vm3, %v1111_v3, -inf  ;;  %v1359_v6 = vrot.slane %v1354_v1, %v794_v36 }
 0x2c3   : > { %1115 = vmax.xlane.f32.xlu0 %v1114_v7  ;;  %v2361_v8 = vpop.f32.mrf.mxu1 }
 0x2c5   : > { %v1097_v9 = vpop.f32.mrf.mxu1 }
 0x2c6   : > { %v1104_v10 = vmul.f32 0.17677669, %v1097_v9 }
 0x2c7   : > { %v2366_v11 = vpop.f32.mrf.mxu1 }
 0x2c8   : > { %v1112_v12 = vadd.f32 %v1110_v0, %v1104_v10 }
 0x2c9   : > { %v1100_v13 = vpop.f32.mrf.mxu1 }
 0x2ca   : > { %v1117_v14 = vsel %vm1113_vm3, %v1112_v12, -inf }
 0x2cb   : > { %1118 = vmax.xlane.f32.xlu0 %v1117_v14  ;;  %v2367_v15 = vpop.f32.mrf.mxu1 }
 0x34c   : > { %v1116_v16 = vpop.xlane.xlu0 %1115 }
 0x34d   : > { %v1120_v17 = vsub.f32 %v1111_v3, %v1116_v16 }
 0x34f   : > { %v1122_v18 = vmul.f32 1.442695, %v1120_v17 }
 0x351   : > { %2634 = vpow2.f32 %v1122_v18 }
 0x354   : > { %v1119_v19 = vpop.xlane.xlu0 %1118 }
 0x355   : > { %v1121_v20 = vsub.f32 %v1112_v12, %v1119_v19 }
 0x357   : > { %v1124_v21 = vmul.f32 1.442695, %v1121_v20 }
 0x359   : > { %2636 = vpow2.f32 %v1124_v21 }
 0x35e   : > { %v2635_v22 = vpop.eup %2634 }
 0x35f   : > { %v1126_v23 = vsel %vm1113_vm3, %v2635_v22, 0.0 }
 0x360   : > { %1127 = vadd.xlane.f32.xlu1 %v1126_v23 }
 0x366   : > { %v2637_v24 = vpop.eup %2636 }
 0x367   : > { %v1129_v27 = vsel %vm1113_vm3, %v2637_v24, 0.0 }
 0x368   : > { %1130 = vadd.xlane.f32.xlu1 %v1129_v27 }
 0x3e9   : > { %v1128_v35 = vpop.xlane.xlu1 %1127 }
 0x3ea   : > { %2638 = vrcp.f32 %v1128_v35 }
 0x3f1   : > { %v1131_v37 = vpop.xlane.xlu1 %1130 }
 0x3f2   : > { %2640 = vrcp.f32 %v1131_v37 }
 0x3f7   : > { %v2639_v38 = vpop.eup %2638 }
 0x3f8   : > { %v1133_v39 = vmul.f32 %v2639_v38, %v2635_v22 }
 0x3fa   : > { %v1136_v40 = vpack.c.bf16 %v1133_v39, %v1133_v39  ;;  %1766 = vst.msk [vmem:[%s3427_s12] sm:$0xff] %vm1113_vm3, %v1133_v39 }
 0x3fc   : > { %2371 = vmatmul.mubr.msk.bf16.vlgmr.msra.gmra.mxu1 %vm1113_vm3, %v1136_v40 }
 0x3fd   : > { %2375 = vmatpush3.bf16.msra.mxu1 %v1191_v61  ;;  %2376 = vmatprep.mubr.msk.bf16.mxu1 %vm3006_vm0, %v3005_v5 }
 0x3fe   : > { %1405 = vmatprep.subr.bf16.mxu1 %v2614_v41 }
 0x3ff   : > { %v2641_v42 = vpop.eup %2640 }
 0x400   : > { %v1135_v43 = vmul.f32 %v2641_v42, %v2637_v24 }
 0x402   : > { %v1137_v45 = vpack.c.bf16 %v1135_v43, %v1135_v43  ;;  %1767 = vst.msk [vmem:[%s3427_s12 + $0x8] sm:$0xff] %vm1113_vm3, %v1135_v43 }
 0x404   : > { %2377 = vmatmul.mubr.msk.bf16.vlgmr.msra.gmra.mxu1 %vm1113_vm3, %v1137_v45 }
 0x405   : > { %1406 = vmatpush1.bf16.msra.mxu1 %v2612_v44  ;;  %1425 = vmatprep.mubr.bf16.mxu1 %v3004_v4 }
 0x406   : > { %1407 = vmatprep.subr.bf16.mxu1 %v2618_v46 }
 0x409   : > { %1408 = vmatpush1.bf16.msra.mxu1 %v2616_v47 }
 0x40a   : > { %2400 = vmatprep.subr.bf16.mxu1 %v3005_v5 }
 0x40c   : > { %2248 = vmatmul.mubr.msk.bf16.vlgmr.msra.gmra.mxu1 %vm1386_vm4, %v1352_v50 }
 0x40d   : > { %1435 = vmatprep.mubr.bf16.mxu1 %v3004_v4  ;;  %v2625_v4 = vld [vmem:[%s3417_s10] sm:$0xff]   ;;  %s3759_s10 = scalar_lea.vmem [#allocation12], %s3369_s28 }
 0x40e   : > { %2395 = vmatpush3.bf16.msra.mxu0 %v2625_v4 }
 0x40f   : > { %2412 = vmatprep.subr.bf16.mxu0 %v3005_v5 }
 0x414   : > { %2249 = vmatmul.mubr.msk.bf16.gmra.mxu1 %vm1386_vm4, %v1353_v54 }
 0x415   : > { %2402 = vmatprep.mubr.msk.bf16.mxu1 %vm3006_vm0, %v3005_v5 }
 0x4bc   : > { %v1181_v56 = vpop.f32.mrf.mxu1 }
 0x4bd   : > { %v3555_v61 = vadd.f32 %v1181_v56, %v3465_v25  ;;  %v1363_v25 = vrot.slane %v1354_v1, %v798_v33 }
 0x4be   : > { %v2372_v57 = vpop.f32.mrf.mxu1 }
 0x4c0   : > { %v1184_v58 = vpop.f32.mrf.mxu1 }
 0x4c2   : > { %v2373_v59 = vpop.f32.mrf.mxu1 }
 0x4c4   : > { %v1227_v60 = vpop.f32.mrf.mxu1 }
 0x4c5   : > { %v3558_v62 = vadd.f32 %v1227_v60, %v3467_v26 }
 0x4c6   : > { %v2378_v63 = vpop.f32.mrf.mxu1 }
 0x4c7   : > { %v1251_v0 = vpack.c.bf16 %v3558_v62, %v3555_v61 }
 0x4c8   : > { %v1230_v2 = vpop.f32.mrf.mxu1 }
 0x4c9   : > { %2397 = vmatmul.mubr.bf16.vlgmr.msra.gmra.mxu0 %v1251_v0  ;;  %v2626_v0 = vld [vmem:[%s3396_s14 + $0x38] sm:$0xff]   ;;  %v2627_v2 = vld [vmem:[%s3396_s14 + $0x30] sm:$0xff]  }
 0x4ca   : > { %v2379_v3 = vpop.f32.mrf.mxu1  ;;  %2414 = vmatprep.mubr.msk.bf16.mxu0 %vm3006_vm0, %v3005_v5 }
 0x4cc   : > { %v1427_v7 = vpop.f32.mrf.mxu1 }
 0x4cd   : > { %v1428_v8 = vadd.f32 %v1427_v7, %v1359_v6  ;;  %v2628_v7 = vld [vmem:[%s3396_s14 + $0x28] sm:$0xff]  }
 0x4ce   : > { %v1429_v26 = vpop.f32.mrf.mxu1 }
 0x4cf   : > { %v1430_v10 = vadd.f32 %v1429_v26, %v1363_v25  ;;  %v2629_v26 = vld [vmem:[%s3396_s14 + $0x20] sm:$0xff]  }
 0x4d0   : > { %v1431_v9 = vpop.f32.mrf.mxu1 }
 0x4d1   : > { %v1432_v11 = vadd.f32 %v1431_v9, %v1359_v6  ;;  %v2631_v9 = vld [vmem:[%s3396_s14 + $0x10] sm:$0xff]  }
 0x4d2   : > { %v1433_v12 = vpop.f32.mrf.mxu1 }
 0x4d3   : > { %v1448_v13 = vpack.c.bf16 %v1432_v11, %v1428_v8  ;;  %v1434_v14 = vadd.f32 %v1433_v12, %v1363_v25  ;;  %v2630_v8 = vld [vmem:[%s3396_s14 + $0x18] sm:$0xff]   ;;  %v2633_v11 = vld [vmem:[%s3396_s14] sm:$0xff]  }
 0x4d4   : > { %v1437_v36 = vpop.f32.mrf.mxu1 }
 0x4d5   : > { %v1557_v15 = vpack.c.bf16 %v1434_v14, %v1430_v10  ;;  %2401 = vmatpush3.bf16.xpose.msra.mxu1 %v1448_v13  ;;  %v1438_v17 = vadd.f32 %v1437_v36, %v1359_v6  ;;  %v2632_v10 = vld [vmem:[%s3396_s14 + $0x8] sm:$0xff]  }
 0x4d6   : > { %2406 = vmatprep.subr.bf16.mxu1 %v3005_v5  ;;  %v1439_v16 = vpop.f32.mrf.mxu1 }
 0x4d7   : > { %2413 = vmatpush3.bf16.msra.mxu0 %v1557_v15  ;;  %v1440_v30 = vadd.f32 %v1439_v16, %v1363_v25 }
 0x4d8   : > { %2424 = vmatprep.subr.bf16.mxu0 %v3005_v5  ;;  %v1441_v33 = vpop.f32.mrf.mxu1 }
 0x4d9   : > { %v1442_v18 = vadd.f32 %v1441_v33, %v1359_v6 }
 0x4da   : > { %v1443_v27 = vpop.f32.mrf.mxu1 }
 0x4db   : > { %v1449_v23 = vpack.c.bf16 %v1442_v18, %v1438_v17  ;;  %v1444_v31 = vadd.f32 %v1443_v27, %v1363_v25 }
 0x4dd   : > { %v1558_v35 = vpack.c.bf16 %v1444_v31, %v1440_v30 }
 0x589   : > { %v1341_v19 = vpop.f32.mrf.mxu0 }
 0x58a   : > { %v1342_v20 = vadd.f32 %v2235_v32, %v1341_v19 }
 0x58b   : > { %v2398_v21 = vpop.f32.mrf.mxu0 }
 0x58c   : > { %v1446_v22 = vpack.c.bf16 %v1342_v20, %v1342_v20  ;;  %v2252_v20 = vld [vmem:[%s3759_s10] ss:$0 sm:$0xff] }
 0x58d   : > { %v1344_v24 = vpop.f32.mrf.mxu0 }
 0x58e   : > { %2403 = vmatmul.mubr.bf16.vlgmr.msra.gmra.mxu1 %v1446_v22  ;;  %v1345_v29 = vadd.f32 %v2235_v32, %v1344_v24 }
 0x58f   : > { %2407 = vmatpush3.bf16.xpose.msra.mxu1 %v1449_v23  ;;  %v2399_v28 = vpop.f32.mrf.mxu0  ;;  %2408 = vmatprep.mubr.msk.bf16.mxu1 %vm3006_vm0, %v3005_v5 }
 0x590   : > { %2418 = vmatprep.subr.bf16.mxu1 %v3005_v5  ;;  %v1447_v34 = vpack.c.bf16 %v1345_v29, %v1345_v29 }
 0x596   : > { %2409 = vmatmul.mubr.bf16.vlgmr.msra.gmra.mxu1 %v1447_v34 }
 0x597   : > { %2419 = vmatpush3.bf16.msra.mxu1 %v1558_v35  ;;  %2420 = vmatprep.mubr.msk.bf16.mxu1 %vm3006_vm0, %v3005_v5 }
 0x64e   : > { %v1484_v37 = vpop.f32.mrf.mxu1 }
 0x64f   : > { %v1530_v38 = vmul.f32 0.17677669, %v1484_v37 }
 0x650   : > { %v2404_v39 = vpop.f32.mrf.mxu1 }
 0x651   : > { %v1533_v40 = vsel %vm1532_vm5, %v1530_v38, -inf }
 0x652   : > { %1534 = vmax.xlane.f32.xlu0 %v1533_v40  ;;  %v1487_v41 = vpop.f32.mrf.mxu1 }
 0x654   : > { %v2405_v42 = vpop.f32.mrf.mxu1 }
 0x656   : > { %v1524_v43 = vpop.f32.mrf.mxu1 }
 0x657   : > { %v1531_v44 = vmul.f32 0.17677669, %v1524_v43 }
 0x658   : > { %v2410_v45 = vpop.f32.mrf.mxu1 }
 0x659   : > { %v1536_v46 = vsel %vm1532_vm5, %v1531_v44, -inf }
 0x65a   : > { %1537 = vmax.xlane.f32.xlu1 %v1536_v46  ;;  %v1527_v47 = vpop.f32.mrf.mxu1 }
 0x65c   : > { %v2411_v48 = vpop.f32.mrf.mxu1 }
 0x6db   : > { %v1535_v49 = vpop.xlane.xlu0 %1534 }
 0x6dc   : > { %v1539_v50 = vsub.f32 %v1530_v38, %v1535_v49 }
 0x6de   : > { %v1541_v51 = vmul.f32 1.442695, %v1539_v50 }
 0x6e0   : > { %2642 = vpow2.f32 %v1541_v51 }
 0x6e3   : > { %v1538_v52 = vpop.xlane.xlu1 %1537 }
 0x6e4   : > { %v1540_v53 = vsub.f32 %v1531_v44, %v1538_v52 }
 0x6e6   : > { %v1543_v54 = vmul.f32 1.442695, %v1540_v53 }
 0x6e8   : > { %2644 = vpow2.f32 %v1543_v54 }
 0x6ed   : > { %v2643_v55 = vpop.eup %2642 }
 0x6ee   : > { %v1545_v4 = vsel %vm1532_vm5, %v2643_v55, 0.0 }
 0x6ef   : > { %1546 = vadd.xlane.f32.xlu0 %v1545_v4 }
 0x6f5   : > { %v2645_v56 = vpop.eup %2644 }
 0x6f6   : > { %v1548_v57 = vsel %vm1532_vm5, %v2645_v56, 0.0 }
 0x6f7   : > { %1549 = vadd.xlane.f32.xlu1 %v1548_v57 }
 0x778   : > { %v1547_v58 = vpop.xlane.xlu0 %1546 }
 0x779   : > { %2646 = vrcp.f32 %v1547_v58 }
 0x780   : > { %v1550_v59 = vpop.xlane.xlu1 %1549 }
 0x781   : > { %2648 = vrcp.f32 %v1550_v59 }
 0x786   : > { %v2647_v60 = vpop.eup %2646 }
 0x787   : > { %v1552_v63 = vmul.f32 %v2647_v60, %v2643_v55 }
 0x789   : > { %1768 = vst.msk [vmem:[%s3429_s2] sm:$0xff] %vm1532_vm5, %v1552_v63  ;;  %v1555_v1 = vpack.c.bf16 %v1552_v63, %v1552_v63 }
 0x78b   : > { %2415 = vmatmul.mubr.msk.bf16.vlgmr.msra.gmra.mxu0 %vm1532_vm5, %v1555_v1 }
 0x78c   : > { %2425 = vmatpush3.bf16.msra.mxu0 %v2626_v0  ;;  %2440 = vmatprep.mubr.msk.bf16.mxu0 %vm3006_vm0, %v3005_v5 }
 0x78d   : > { %2426 = vmatprep.subr.bf16.mxu0 %v3005_v5 }
 0x78e   : > { %v2649_v3 = vpop.eup %2648 }
 0x78f   : > { %v1554_v6 = vmul.f32 %v2649_v3, %v2645_v56 }
 0x790   : > { %2427 = vmatpush3.bf16.msra.mxu0 %v2627_v2 }
 0x791   : > { %1769 = vst.msk [vmem:[%s3429_s2 + $0x8] sm:$0xff] %vm1532_vm5, %v1554_v6  ;;  %v1556_v25 = vpack.c.bf16 %v1554_v6, %v1554_v6  ;;  %2428 = vmatprep.subr.bf16.mxu0 %v3005_v5 }
 0x793   : > { %2421 = vmatmul.mubr.msk.bf16.vlgmr.msra.gmra.mxu1 %vm1532_vm5, %v1556_v25 }
 0x794   : > { %2429 = vmatpush3.bf16.msra.mxu0 %v2628_v7 }
 0x795   : > { %2430 = vmatprep.subr.bf16.mxu0 %v3005_v5 }
 0x798   : > { %2431 = vmatpush3.bf16.msra.mxu0 %v2629_v26 }
 0x799   : > { %2432 = vmatprep.subr.bf16.mxu0 %v3005_v5 }
 0x79c   : > { %2433 = vmatpush3.bf16.msra.mxu0 %v2630_v8 }
 0x79d   : > { %2434 = vmatprep.subr.bf16.mxu0 %v3005_v5 }
 0x7a0   : > { %2435 = vmatpush3.bf16.msra.mxu0 %v2631_v9 }
 0x7a1   : > { %2436 = vmatprep.subr.bf16.mxu0 %v3005_v5 }
 0x7a4   : > { %2437 = vmatpush3.bf16.msra.mxu0 %v2632_v10 }
 0x7a5   : > { %2438 = vmatprep.subr.bf16.mxu0 %v3005_v5 }
 0x7a8   : > { %2439 = vmatpush3.bf16.msra.mxu0 %v2633_v11 }
 0x84b   : > { %v1596_v12 = vpop.f32.mrf.mxu0 }
 0x84c   : > { %v1645_v16 = vadd.f32 %v1596_v12, %v3555_v61 }
 0x84d   : > { %v2416_v13 = vpop.f32.mrf.mxu0 }
 0x84f   : > { %v1599_v14 = vpop.f32.mrf.mxu0 }
 0x851   : > { %v2417_v15 = vpop.f32.mrf.mxu0 }
 0x853   : > { %v1639_v36 = vpop.f32.mrf.mxu1 }
 0x854   : > { %v1646_v32 = vadd.f32 %v1639_v36, %v3558_v62 }
 0x855   : > { %v2422_v33 = vpop.f32.mrf.mxu1 }
 0x856   : > { %v1663_v17 = vpack.c.bf16 %v1646_v32, %v1645_v16 }
 0x857   : > { %v1642_v18 = vpop.f32.mrf.mxu1 }
 0x858   : > { %2441 = vmatmul.mubr.bf16.vlgmr.msra.gmra.mxu0 %v1663_v17 }
 0x859   : > { %v2423_v19 = vpop.f32.mrf.mxu1 }
 0x918   : > { %v1753_v21 = vpop.f32.mrf.mxu0 }
 0x919   : > { %v1754_v5 = vadd.f32 %v2252_v20, %v1753_v21 }
 0x91a   : > { %v2442_v22 = vpop.f32.mrf.mxu0 }
 0x91b   : > { %v1760_v23 = vmax.f32 %v1754_v5, 0.0 }
 0x91c   : > { %v1756_v24 = vpop.f32.mrf.mxu0 }
 0x91d   : > { %v1762_v27 = vadd.f32 %v1760_v23, %v1645_v16  ;;  %v1757_v28 = vadd.f32 %v2252_v20, %v1756_v24 }
 0x91e   : > { %v2443_v29 = vpop.f32.mrf.mxu0 }
 0x91f   : > { %1764 = vst [vmem:[#allocation2] sm:$0xff] %v1762_v27  ;;  %v1761_v30 = vmax.f32 %v1757_v28, 0.0  ;;  %1773 = sbr.rel (%p2261_p13) target bundleno = 2573 (0xa0d), region = 108 }
 0x921   : > { %v1763_v61 = vadd.f32 %v1761_v30, %v1646_v32 }
 0x923   : > { %1765 = vst [vmem:[#allocation2 + $0x8] sm:$0xff] %v1763_v61 }
 0x924   : > { %v2650_v62 = vld [vmem:[#allocation14 + $0x38] sm:$0xff]   ;;  %v3007_v31 = vmov 0.0   ;;  %v2651_v34 = vld [vmem:[#allocation14 + $0x30] sm:$0xff]   ;;  %vm3008_vm6 = vmmov 0   ;;  %v2652_v35 = vld [vmem:[#allocation14 + $0x28] sm:$0xff]   ;;  %v1790_v42 = vpack.c.bf16 %v1763_v61, %v1762_v27 }
 0x925   : > { %2444 = vmatprep.subr.bf16.mxu0 %v3007_v31  ;;  %2460 = vmatprep.mubr.msk.bf16.mxu0 %vm3008_vm6, %v3007_v31  ;;  %v2653_v37 = vld [vmem:[#allocation14 + $0x20] sm:$0xff]   ;;  %v2654_v38 = vld [vmem:[#allocation14 + $0x18] sm:$0xff]   ;;  %v2655_v39 = vld [vmem:[#allocation14 + $0x10] sm:$0xff]  }
 0x926   : > { %2445 = vmatpush3.bf16.msra.mxu0 %v2650_v62  ;;  %v2656_v40 = vld [vmem:[#allocation14 + $0x8] sm:$0xff]   ;;  %v2657_v41 = vld [vmem:[#allocation14] sm:$0xff]  }
 0x927   : > { %2446 = vmatprep.subr.bf16.mxu0 %v3007_v31  ;;  %v2262_v43 = vld [vmem:[#allocation15] ss:$0 sm:$0xff] }
 0x92a   : > { %2447 = vmatpush3.bf16.msra.mxu0 %v2651_v34 }
 0x92b   : > { %2448 = vmatprep.subr.bf16.mxu0 %v3007_v31 }
 0x92e   : > { %2449 = vmatpush3.bf16.msra.mxu0 %v2652_v35 }
 0x92f   : > { %2450 = vmatprep.subr.bf16.mxu0 %v3007_v31 }
 0x932   : > { %2451 = vmatpush3.bf16.msra.mxu0 %v2653_v37 }
 0x933   : > { %2452 = vmatprep.subr.bf16.mxu0 %v3007_v31 }
 0x936   : > { %2453 = vmatpush3.bf16.msra.mxu0 %v2654_v38 }
 0x937   : > { %2454 = vmatprep.subr.bf16.mxu0 %v3007_v31 }
 0x93a   : > { %2455 = vmatpush3.bf16.msra.mxu0 %v2655_v39 }
 0x93b   : > { %2456 = vmatprep.subr.bf16.mxu0 %v3007_v31 }
 0x93e   : > { %2457 = vmatpush3.bf16.msra.mxu0 %v2656_v40 }
 0x93f   : > { %2458 = vmatprep.subr.bf16.mxu0 %v3007_v31 }
 0x942   : > { %2459 = vmatpush3.bf16.msra.mxu0 %v2657_v41 }
 0x945   : > { %2461 = vmatmul.mubr.bf16.vlgmr.msra.gmra.mxu0 %v1790_v42 }
 0xa05   : > { %v1880_v44 = vpop.f32.mrf.mxu0 }
 0xa06   : > { %v1881_v45 = vadd.f32 %v2262_v43, %v1880_v44 }
 0xa07   : > { %v2462_v46 = vpop.f32.mrf.mxu0 }
 0xa08   : > { %1887 = vst [vmem:[#allocation17] sm:$0xff] %v1881_v45 }
 0xa09   : > { %v1883_v47 = vpop.f32.mrf.mxu0 }
 0xa0a   : > { %v1884_v48 = vadd.f32 %v2262_v43, %v1883_v47 }
 0xa0b   : > { %v2463_v49 = vpop.f32.mrf.mxu0 }
 0xa0c   : > { %1888 = vst [vmem:[#allocation17 + $0x8] sm:$0xff] %v1884_v48 }
 0xa0d PF: > { %s3009_s14 = smov [#allocation17]   ;;  %p3760_p3 = scmp.eq.s32.totalorder %s3109_s17, 1 }
 0xa0e   : > { %s1905_s19 = sshll.u32 %s3009_s14, 4  ;;  %s1906_s19 = int_to_ptr.vmem [resolvable:$true] %s1905_s19 }
 0xa0f   : > { %s2878_s18 = scalar_lea.vmem %s1906_s19, 256  ;;  %p2885_p1 = scmp.lt.s32.totalorder %s1906_s19, %s1906_s19 }
 0xa10   : > { %p2879_p0 = scmp.ne.s32.totalorder %s1906_s19, %s2878_s18  ;;  %p2886_p8 = scmp.lt.s32.totalorder %s2878_s18, %s2878_s18 }
 0xa12   : > { %p2880_p9 = pnand %p2879_p0, %p3760_p3  ;;  %p2887_p7 = por %p2886_p8, %p2885_p1 }
 0xa14   : > { %p2881_p12 = pneg %p2880_p9 }
 0xa16   : > { %p2888_p4 = pnand %p2887_p7, %p2881_p12 }
 0xa18   : > { %2891 = shalt.err (!%p2888_p4)
}
 0xa19   : > { %s3010_s23 = smov 128   ;;  %s3761_s4 = sld [smem:[#allocation32_spill]] }
 0xa1a   : > { %s3011_s29 = smov 8   ;;  %p3762_p10 = pmov %p3760_p3 }
 0xa1b   : > { %s3763_s15 = sld [smem:[#allocation42_spill]]  ;;  %s2283_s0 = sshll.u32 %s3109_s17, 8 }
 0xa1c   : > { %s1924_s5 = sshll.u32 %s3429_s2, 4  ;;  %s3764_s1 = sld [smem:[#allocation44_spill]]  ;;  %s3627_s5 = int_to_ptr.vmem [resolvable:$true] %s1924_s5 }
 0xa1d   : > { %s1895_s21 = scalar_lea.sflag [#allocation19], %s3369_s28  ;;  %s2902_s22 = scalar_lea.vmem %s3627_s5, 256 }
 0xa1e   : > { %p2903_p2 = scmp.ne.s32.totalorder %s3627_s5, %s2902_s22  ;;  %s3012_s27 = smov [#allocation18]  }
 0xa1f   : > { %p3765_p5 = scmp.ne.s32.totalorder %s3761_s4, 0  ;;  %s2906_s6 = sshll.u32 %s3012_s27, 4  ;;  %s2907_s6 = int_to_ptr.vmem [resolvable:$false] %s2906_s6 }
 0xa20   : > { %s2908_s2 = scalar_lea.vmem %s2907_s6, 512  ;;  %p2909_p13 = scmp.lt.s32.totalorder %s3627_s5, %s2907_s6 }
 0xa21   : > { %2491 = dma.vmem_to_hbm [thread:$0]  (%p3762_p10), %s1906_s19, 256, %s3763_s15, [#allocation5], %s3010_s23, %s3010_s23, %s3011_s29  }
 0xa22   : > { %s3625_s12 = scalar_lea.hbm %s3764_s1, %s2283_s0  ;;  %p2904_p11 = pnand %p2903_p2, %p3765_p5 }
 0xa23   : > { %p2910_p0 = scmp.lt.s32.totalorder %s2908_s2, %s2902_s22 }
 0xa24   : > { %p2905_p6 = pneg %p2904_p11 }
 0xa25   : > { %p2911_p3 = por %p2910_p0, %p2909_p13 }
 0xa27   : > { %p2912_p9 = pnand %p2911_p3, %p2905_p6 }
 0xa29   : > { %2915 = shalt.err (!%p2912_p9)
}
 0xa2a   : > { %s2916_s10 = scalar_lea.hbm %s3625_s12, 256  ;;  %s2920_s19 = scalar_lea.hbm %s3764_s1, 512 }
 0xa2b   : > { %p2917_p12 = scmp.ne.s32.totalorder %s3625_s12, %s2916_s10  ;;  %p2921_p7 = scmp.lt.s32.totalorder %s3625_s12, %s3764_s1 }
 0xa2c   : > { %p2922_p4 = scmp.lt.s32.totalorder %s2920_s19, %s2916_s10 }
 0xa2d   : > { %p2918_p1 = pnand %p2917_p12, %p3765_p5 }
 0xa2e   : > { %p2923_p10 = por %p2922_p4, %p2921_p7 }
 0xa2f   : > { %p2919_p8 = pneg %p2918_p1 }
 0xa31   : > { %p2924_p2 = pnand %p2923_p10, %p2919_p8 }
 0xa33   : > { %2927 = shalt.err (!%p2924_p2)
}
 0xa34   : > { %2492 = dma.vmem_to_hbm [thread:$0]  (%p3765_p5), %s3627_s5, 256, %s3625_s12, %s1895_s21, %s3010_s23, %s3010_s23, %s3011_s29  }
 0xa35   : > { %p3766_p11 = scmp.eq.s32.totalorder %s3109_s17, 1 }
 0xa37   : > { %2969 = dma.done.wait (%p3766_p11), [#allocation5], 256   ;;  %p3767_p6 = pmov %p3766_p11 }
 0xa39   : > { %2971 = vsyncadd (%p3767_p6), [#allocation5], 4294967040 }
 0xa3a PF: > { %s3768_s20 = sld [smem:[#allocation28_spill]]  ;;  %p3771_p0 = scmp.ge.s32.totalorder %s2990_s16, 2 }
 0xa3b   : > { %s3769_s15 = sld [smem:[#allocation33_spill]] }
 0xa40   : > { %s1951_s0 = sand.u32 1, %s3768_s20  }
 0xa41   : > { %p3770_p13 = scmp.ne.s32.totalorder %s3769_s15, 0  ;;  %s1952_s4 = scalar_lea.sflag [#allocation19], %s1951_s0 }
 0xa43   : > { %p2523_p3 = pnand %p3771_p0, %p3770_p13 }
 0xa45   : > { %p2524_p9 = pneg %p2523_p3 }
 0xa47   : > { %2973 = dma.done.wait (%p2524_p9), %s1952_s4, 256  }
 0xa48   : > { %2975 = vsyncadd (%p2524_p9), %s1952_s4, 4294967040  ;;  %s3772_s16 = sld [smem:[#allocation30_spill]]  ;;  %s3775_s29 = smov %s2982_s30 }
 0xa49   : > { %s3773_s23 = sld [smem:[#allocation29_spill]] }
 0xa4a   : > { %s3774_s15 = sld [smem:[#allocation31_spill]] }
 0xa4e   : > { %p39_p5 = scmp.ge.s32.totalorder %s3772_s16, 4  }
 0xa4f   : > { %s3776_s30 = smov %s3773_s23 }
 0xa50   :  { %41 = sbr.rel (!%p39_p5) target bundleno = 25 (0x19), region = 217 }
 0xa55   :  { %1957 = vsyncpa [#allocation4], 1 }
 0xa56   :  { %1959 = vsyncpa [#allocation4 + $0x1], 1 }
 0xa57   :  { %1960 = vsyncpa [#allocation7], 1 }
 0xa58   :  { %1962 = vsyncpa [#allocation7 + $0x1], 1 }
 0xa59   :  { %1963 = vsyncpa [#allocation10], 1 }
 0xa5a   :  { %1965 = vsyncpa [#allocation10 + $0x1], 1 }
 0xa5b   :  { %1966 = vsyncpa [#allocation13], 1 }
 0xa5c   :  { %1968 = vsyncpa [#allocation13 + $0x1], 1 }
 0xa5d   :  { %1969 = vsyncpa [#allocation16], 1 }
 0xa5e   :  { %1970 = vsyncpa [#allocation5], 1 }
 0xa5f   :  { %1972 = vsyncpa [#allocation5 + $0x1], 1 }
 0xa60   :  { %1973 = vsyncpa [#allocation19], 1 }
 0xa61   :  { %1975 = vsyncpa [#allocation19 + $0x1], 1 }

</bundles_post_ra>
